<compile_context>
chip_gen: v6e
topology: v6e:2x2x1
jax: 0.10.0
libtpu: 0.0.40
codegen_flags: <defaults>
</compile_context>

<pallas_src>
import functools

import jax
import jax.numpy as jnp
from jax import lax
from jax.experimental import pallas as pl
from jax.experimental.pallas import tpu as pltpu


# ------------------------------- Pallas kernel --------------------------------------
def _fused_upsample_bn_kernel(up_ref, skip_ref, w1_ref, w2_ref, b1_ref, b2_ref,
                              o_ref, a_cat, a_mid, rhs,
                              *, H, W, skip_off, neg_slope):
    """One batch element: concat(up, skip) -> [conv3x3 + BN(folded) + LeakyReLU] x 2.

    Staged activations use a flattened, per-row padded layout: logical (H+3, W+2)
    rows (1 top halo row, H interior rows, 2 bottom halo rows), interior value (h, w)
    at flat lane (h+1)*(W+2) + (w+1).  Tap (dh, dw) is then just the shifted window
    a[:, dh*(W+2)+dw : ... + H*(W+2)] — row seams and the H boundary read real zeros,
    so no seam masks are needed.  All 9 taps of one layer are stacked into a single
    (K, H*(W+2)) RHS and consumed by one MXU matmul per layer.
    """
    Cx = up_ref.shape[1]
    Cs = skip_ref.shape[1]
    Cm = w1_ref.shape[0]                       # layer-1 Cout == layer-2 Cin
    cpad1 = a_cat.shape[0]
    cpad2 = a_mid.shape[0]
    Wp = W + 2
    L = H * Wp                                 # matmul lane extent (padded-stride layout)

    def leaky(v):
        return jnp.where(v >= 0, v, neg_slope * v)

    # Validity mask for the padded-stride layout (columns w >= W are don't-care).
    col_ok = lax.broadcasted_iota(jnp.int32, (1, L), 1) % Wp < W

    # ---- stage concat(up, skip) into the zero-padded layout (the channel concat
    #      and the conv zero padding of the PyTorch module happen right here) -------
    a_cat[...] = jnp.zeros_like(a_cat)         # ~11 KiB: halo rows, pad cols, pad chans
    for h in range(H):
        dst = (h + 1) * Wp + 1
        a_cat[0:Cx, dst:dst + W] = up_ref[0, :, h * W:(h + 1) * W]
        a_cat[skip_off:skip_off + Cs, dst:dst + W] = skip_ref[0, :, h * W:(h + 1) * W]

    # ---- layer 1: one cpad-row K-slot per tap (merged channel groups), one matmul --
    for dh in range(3):
        for dw in range(3):
            off = dh * Wp + dw
            t = dh * 3 + dw
            rhs[t * cpad1:(t + 1) * cpad1, :] = a_cat[:, off:off + L]
    acc1 = jnp.dot(w1_ref[...], rhs[0:9 * cpad1, :],
                   preferred_element_type=jnp.float32)
    y1 = leaky(acc1 + b1_ref[...])             # BN scale folded into w1, bias-only epilogue

    # ---- layer 2: the intermediate never leaves VMEM --------------------------------
    a_mid[...] = jnp.zeros_like(a_mid)
    # A single uniform shift (Wp+1) re-pads y1; one select zeroes its seam columns.
    a_mid[0:Cm, Wp + 1:Wp + 1 + L] = jnp.where(col_ok, y1, 0.0).astype(a_mid.dtype)
    for dh in range(3):
        for dw in range(3):
            off = dh * Wp + dw
            t = dh * 3 + dw
            rhs[t * cpad2:(t + 1) * cpad2, :] = a_mid[:, off:off + L]
    acc2 = jnp.dot(w2_ref[...], rhs[0:9 * cpad2, :],
                   preferred_element_type=jnp.float32)
    y2 = leaky(acc2 + b2_ref[...])

    o_ref[...] = y2.reshape(o_ref.shape)       # last dim = H*(W+2): lane dense


# ------------------------------- wrapper helpers -------------------------------------
def _interp_matrix(out_size, in_size, dtype=jnp.float32):
    """Row-stochastic (out_size, in_size) bilinear matrix, align_corners=True."""
    if out_size == 1 or in_size == 1:
        src = jnp.zeros((out_size,), dtype)
    else:
        src = jnp.arange(out_size, dtype=dtype) * (in_size - 1) / (out_size - 1)
    lo = jnp.clip(jnp.floor(src).astype(jnp.int32), 0, in_size - 1)
    hi = jnp.clip(lo + 1, 0, in_size - 1)
    frac = src - lo.astype(dtype)
    m = jnp.zeros((out_size, in_size), dtype)
    m = m.at[jnp.arange(out_size), lo].add(1.0 - frac)
    m = m.at[jnp.arange(out_size), hi].add(frac)
    return m


def _fold_bn(conv_bias, gamma, beta, mean, var, eps=1e-5):
    scale = gamma / jnp.sqrt(var + eps)
    bias = (conv_bias - mean) * scale + beta
    return scale, bias


def _fold_conv_weight(w_oihw, group_sizes, group_offsets, cpad):
    """(Cout, Cin, 3, 3) -> (Cout, 9*cpad); K index = (kh*3+kw)*cpad + slot_row, where
    each input-channel group lands at its row offset inside the single cpad slot."""
    cout, cin, kh, kw = w_oihw.shape
    assert sum(group_sizes) == cin and kh == 3 and kw == 3
    wt = jnp.transpose(w_oihw, (0, 2, 3, 1))                   # (o, kh, kw, cin)
    folded = jnp.zeros((cout, kh * kw, cpad), w_oihw.dtype)
    start = 0
    for g, off in zip(group_sizes, group_offsets):
        assert off + g <= cpad
        folded = folded.at[:, :, off:off + g].set(
            wt.reshape(cout, kh * kw, cin)[:, :, start:start + g])
        start += g
    return folded.reshape(cout, kh * kw * cpad)


def _ceil_to(x, m):
    return -(-x // m) * m


def upsample_bn_forward(params, x_nchw, skip_nchw, *, neg_slope=0.01, eps=1e-5):
    """UpSampleBN.forward: bilinear-upsample x to skip's size (align_corners=True),
    concat on channels, two fused conv3x3 + BN(eval) + LeakyReLU. NCHW in / NCHW out."""
    N, Cx, Hx, Wx = x_nchw.shape
    Ns, Cs, H, W = skip_nchw.shape
    HW = H * W
    Wp = W + 2
    L = H * Wp                         # kernel-side lane extent (padded row stride)
    Lp = (H + 3) * Wp                  # staging buffer: +1 top / +2 bottom halo rows
    Cout, Cin1 = params['w1_oihw'].shape[:2]
    Ccat = Cx + Cs
    assert Ns == N and Cin1 == Ccat and params['w2_oihw'].shape[1] == Cout

    skip_off = _ceil_to(Cx, 8)                     # sublane-friendly skip-group offset
    cpad1 = _ceil_to(skip_off + Cs, 16)            # single merged K-slot per tap (bf16 tile)
    cpad2 = _ceil_to(Cout, 16)
    K1, K2 = 9 * cpad1, 9 * cpad2
    Kmax = max(K1, K2)

    # Bilinear upsample emitted channels-first; the bf16 cast fuses into the einsum
    # epilogue under jit, and the NCHW <-> (N,C,H*W) reshapes are free.  No pad /
    # concat / transpose materialized in HBM.
    up = jnp.einsum('hH,wW,ncHW->nchw',
                    _interp_matrix(H, Hx), _interp_matrix(W, Wx), x_nchw)
    up_f = up.reshape(N, Cx, HW).astype(jnp.bfloat16)
    skip_f = skip_nchw.reshape(N, Cs, HW).astype(jnp.bfloat16)

    # Fold eval-mode BN: scale into the f32 conv weights (before the bf16 cast),
    # bias into a single epilogue add.
    s1, b1 = _fold_bn(params['b1'], params['g1'], params['be1'],
                      params['m1'], params['v1'], eps)
    s2, b2 = _fold_bn(params['b2'], params['g2'], params['be2'],
                      params['m2'], params['v2'], eps)
    w1f = _fold_conv_weight(params['w1_oihw'] * s1[:, None, None, None],
                            (Cx, Cs), (0, skip_off), cpad1).astype(jnp.bfloat16)
    w2f = _fold_conv_weight(params['w2_oihw'] * s2[:, None, None, None],
                            (Cout,), (0,), cpad2).astype(jnp.bfloat16)
    b1c = b1.reshape(Cout, 1).astype(jnp.float32)
    b2c = b2.reshape(Cout, 1).astype(jnp.float32)

    kernel = functools.partial(_fused_upsample_bn_kernel,
                               H=H, W=W, skip_off=skip_off, neg_slope=neg_slope)

    out = pl.pallas_call(
        kernel,
        out_shape=jax.ShapeDtypeStruct((N, Cout, L), jnp.float32),
        grid_spec=pltpu.PrefetchScalarGridSpec(
            num_scalar_prefetch=0,
            grid=(N,),                                   # "parallel": both v7x TCs get work
            in_specs=[
                pl.BlockSpec((1, Cx, HW), lambda n: (n, 0, 0)),
                pl.BlockSpec((1, Cs, HW), lambda n: (n, 0, 0)),
                pl.BlockSpec((Cout, K1), lambda n: (0, 0)),
                pl.BlockSpec((Cout, K2), lambda n: (0, 0)),
                pl.BlockSpec((Cout, 1), lambda n: (0, 0)),
                pl.BlockSpec((Cout, 1), lambda n: (0, 0)),
            ],
            out_specs=pl.BlockSpec((1, Cout, L), lambda n: (n, 0, 0)),
            scratch_shapes=[
                pltpu.VMEM((cpad1, Lp), jnp.bfloat16),   # padded concat(up, skip) staging
                pltpu.VMEM((cpad2, Lp), jnp.bfloat16),   # padded layer-1 output (VMEM only)
                pltpu.VMEM((Kmax, L), jnp.bfloat16),     # tap-folded RHS, shared by both layers
            ],
        ),
        compiler_params=pltpu.CompilerParams(dimension_semantics=("parallel",)),
    )(up_f, skip_f, w1f, w2f, b1c, b2c)

    # Drop the 2 don't-care padding columns of the (W+2)-stride output layout.
    return out.reshape(N, Cout, H, Wp)[..., :W]


# ------------------------------ pure-JAX reference -----------------------------------
def _ref_block(y, w_scaled_oihw, bias, slope=0.01):
    y = lax.conv_general_dilated(
        y, w_scaled_oihw, window_strides=(1, 1), padding=((1, 1), (1, 1)),
        dimension_numbers=('NCHW', 'OIHW', 'NCHW')) + bias[None, :, None, None]
    return jnp.where(y >= 0, y, slope * y)


def upsample_bn_reference(params, x_nchw, skip_nchw, eps=1e-5):
    """Pure-JAX reference mirroring the kernel's BN folding and bf16 quantization points."""
    _, _, Hx, Wx = x_nchw.shape
    _, _, H, W = skip_nchw.shape
    up = jnp.einsum('hH,wW,ncHW->nchw',
                    _interp_matrix(H, Hx), _interp_matrix(W, Wx), x_nchw)
    f = jnp.concatenate([up, skip_nchw], axis=1)
    f = f.astype(jnp.bfloat16).astype(jnp.float32)
    s1, b1 = _fold_bn(params['b1'], params['g1'], params['be1'],
                      params['m1'], params['v1'], eps)
    s2, b2 = _fold_bn(params['b2'], params['g2'], params['be2'],
                      params['m2'], params['v2'], eps)
    w1 = (params['w1_oihw'] * s1[:, None, None, None]).astype(jnp.bfloat16).astype(jnp.float32)
    w2 = (params['w2_oihw'] * s2[:, None, None, None]).astype(jnp.bfloat16).astype(jnp.float32)
    y = _ref_block(f, w1, b1)
    y = y.astype(jnp.bfloat16).astype(jnp.float32)   # kernel holds the intermediate in bf16
    return _ref_block(y, w2, b2)


# --------------------------------------- main ----------------------------------------
if __name__ == "__main__":
    key = jax.random.PRNGKey(0)
    ks = jax.random.split(key, 12)

    # small shapes consistent with the decoder block
    N, Cx, Hx, Wx = 2, 4, 8, 8            # low-res feature map x
    Cs, Ho, Wo = 8, 16, 16                # skip connection (concat_with)
    skip_input = Cx + Cs                  # = 12
    output_features = 16

    x = jax.random.normal(ks[0], (N, Cx, Hx, Wx), jnp.float32)
    concat_with = jax.random.normal(ks[1], (N, Cs, Ho, Wo), jnp.float32)

    w1_oihw = 0.1 * jax.random.normal(ks[2], (output_features, skip_input, 3, 3), jnp.float32)
    b1 = 0.05 * jax.random.normal(ks[3], (output_features,), jnp.float32)
    g1 = 1.0 + 0.1 * jax.random.normal(ks[4], (output_features,), jnp.float32)
    be1 = 0.1 * jax.random.normal(ks[5], (output_features,), jnp.float32)
    m1 = 0.1 * jax.random.normal(ks[6], (output_features,), jnp.float32)
    v1 = 0.9 + 0.2 * jax.random.uniform(ks[7], (output_features,), jnp.float32)

    w2_oihw = 0.1 * jax.random.normal(ks[8], (output_features, output_features, 3, 3), jnp.float32)
    b2 = 0.05 * jax.random.normal(ks[9], (output_features,), jnp.float32)
    g2 = 1.0 + 0.1 * jax.random.normal(ks[10], (output_features,), jnp.float32)
    be2 = 0.1 * jax.random.normal(ks[11], (output_features,), jnp.float32)
    m2 = jnp.linspace(-0.1, 0.1, output_features, dtype=jnp.float32)
    v2 = jnp.linspace(0.8, 1.2, output_features, dtype=jnp.float32)

    params = dict(w1_oihw=w1_oihw, b1=b1, g1=g1, be1=be1, m1=m1, v1=v1,
                  w2_oihw=w2_oihw, b2=b2, g2=g2, be2=be2, m2=m2, v2=v2)

    out = jax.block_until_ready(jax.jit(upsample_bn_forward)(params, x, concat_with))
    ref = jax.block_until_ready(upsample_bn_reference(params, x, concat_with))

    assert out.shape == (N, output_features, Ho, Wo), out.shape
    err = float(jnp.max(jnp.abs(out - ref)))
    assert jnp.allclose(out, ref, rtol=5e-3, atol=5e-3), err

    print("KERNEL_OK")
</pallas_src>

<mosaic_0001>
module attributes {stable_mosaic.version = 11 : i64} {
  func.func private @main(%arg0: i32) attributes {dimension_semantics = [#tpu.dimension_semantics<core_parallel>], iteration_bounds = array<i64: 2>, tpu.core_type = #tpu.core_type<sc_scalar_subcore>, window_params = []} {
    return
  }
}

module attributes {stable_mosaic.version = 11 : i64} {
  func.func private @main(%arg0: i32) attributes {dimension_semantics = [#tpu.dimension_semantics<core_parallel>], iteration_bounds = array<i64: 2>, tpu.core_type = #tpu.core_type<sc_scalar_subcore>, window_params = []} {
    return
  }
}

module attributes {stable_mosaic.version = 11 : i64} {
  func.func @_fused_upsample_bn_kernel(%arg0: i32, %arg1: memref<1x4x256xbf16, #tpu.memory_space<vmem>>, %arg2: memref<1x8x256xbf16, #tpu.memory_space<vmem>>, %arg3: memref<16x144xbf16, #tpu.memory_space<vmem>>, %arg4: memref<16x144xbf16, #tpu.memory_space<vmem>>, %arg5: memref<16x1xf32, #tpu.memory_space<vmem>>, %arg6: memref<16x1xf32, #tpu.memory_space<vmem>>, %arg7: memref<1x16x288xf32, #tpu.memory_space<vmem>>, %arg8: memref<16x342xbf16, #tpu.memory_space<vmem>>, %arg9: memref<16x342xbf16, #tpu.memory_space<vmem>>, %arg10: memref<144x288xbf16, #tpu.memory_space<vmem>>) attributes {dimension_semantics = [#tpu.dimension_semantics<parallel>], iteration_bounds = array<i64: 2>, scalar_prefetch = 0 : i64, scratch_operands = 3 : i64, tpu.core_type = #tpu.core_type<tc>, window_params = [{transform_indices = @transform_0, window_bounds = array<i64: 1, 4, 256>}, {transform_indices = @transform_1, window_bounds = array<i64: 1, 8, 256>}, {pipeline_mode = #tpu.pipeline_mode<synchronous>, transform_indices = @transform_2, window_bounds = array<i64: 16, 144>}, {pipeline_mode = #tpu.pipeline_mode<synchronous>, transform_indices = @transform_3, window_bounds = array<i64: 16, 144>}, {pipeline_mode = #tpu.pipeline_mode<synchronous>, transform_indices = @transform_4, window_bounds = array<i64: 16, 1>}, {pipeline_mode = #tpu.pipeline_mode<synchronous>, transform_indices = @transform_5, window_bounds = array<i64: 16, 1>}, {transform_indices = @transform_6, window_bounds = array<i64: 1, 16, 288>}]} {
    %0 = tpu.iota {dimensions = array<i32: 1>} : vector<1x288xi32>
    %c18_i32 = arith.constant 18 : i32
    %c0_i32 = arith.constant 0 : i32
    %1 = arith.cmpi eq, %c18_i32, %c0_i32 : i32
    %c1_i32 = arith.constant 1 : i32
    %2 = arith.select %1, %c1_i32, %c18_i32 : i32
    %3 = vector.broadcast %2 : i32 to vector<1x288xi32>
    %4 = arith.remsi %0, %3 : vector<1x288xi32>
    %c0_i32_0 = arith.constant 0 : i32
    %5 = vector.broadcast %c0_i32_0 : i32 to vector<1x288xi32>
    %6 = arith.cmpi ne, %4, %5 : vector<1x288xi32>
    %c0_i32_1 = arith.constant 0 : i32
    %7 = vector.broadcast %c0_i32_1 : i32 to vector<1x288xi32>
    %8 = arith.cmpi slt, %4, %7 : vector<1x288xi32>
    %c0_i32_2 = arith.constant 0 : i32
    %9 = arith.cmpi slt, %2, %c0_i32_2 : i32
    %10 = vector.broadcast %9 : i1 to vector<1x288xi1>
    %11 = vector.broadcast %10 : vector<1x288xi1> to vector<1x288xi1>
    %12 = arith.xori %8, %11 : vector<1x288xi1>
    %13 = arith.andi %12, %6 : vector<1x288xi1>
    %14 = vector.broadcast %2 : i32 to vector<1x288xi32>
    %15 = arith.addi %4, %14 : vector<1x288xi32>
    %16 = arith.select %13, %15, %4 : vector<1x288xi1>, vector<1x288xi32>
    %c16_i32 = arith.constant 16 : i32
    %17 = vector.broadcast %c16_i32 : i32 to vector<1x288xi32>
    %18 = arith.cmpi slt, %16, %17 : vector<1x288xi32>
    %cst = arith.constant 0.000000e+00 : bf16
    %19 = vector.broadcast %cst : bf16 to vector<16x342xbf16>
    %c0 = arith.constant 0 : index
    %c0_3 = arith.constant 0 : index
    %20 = vector.load %arg8[%c0, %c0_3] : memref<16x342xbf16, #tpu.memory_space<vmem>>, vector<16x342xbf16>
    tpu.vector_store %arg8[%c0, %c0_3], %19 {strides = array<i32>} : memref<16x342xbf16, #tpu.memory_space<vmem>>, vector<16x342xbf16>,
    %c0_4 = arith.constant 0 : index
    %c0_5 = arith.constant 0 : index
    %c0_6 = arith.constant 0 : index
    %21 = vector.load %arg1[%c0_4, %c0_5, %c0_6] : memref<1x4x256xbf16, #tpu.memory_space<vmem>>, vector<1x4x16xbf16>
    %22 = vector.shape_cast %21 : vector<1x4x16xbf16> to vector<4x16xbf16>
    %c0_7 = arith.constant 0 : index
    %c19 = arith.constant 19 : index
    %23 = vector.load %arg8[%c0_7, %c19] : memref<16x342xbf16, #tpu.memory_space<vmem>>, vector<4x16xbf16>
    tpu.vector_store %arg8[%c0_7, %c19], %22 {strides = array<i32>} : memref<16x342xbf16, #tpu.memory_space<vmem>>, vector<4x16xbf16>,
    %c0_8 = arith.constant 0 : index
    %c0_9 = arith.constant 0 : index
    %c0_10 = arith.constant 0 : index
    %24 = vector.load %arg2[%c0_8, %c0_9, %c0_10] : memref<1x8x256xbf16, #tpu.memory_space<vmem>>, vector<1x8x16xbf16>
    %25 = vector.shape_cast %24 : vector<1x8x16xbf16> to vector<8x16xbf16>
    %c8 = arith.constant 8 : index
    %c19_11 = arith.constant 19 : index
    %26 = vector.load %arg8[%c8, %c19_11] : memref<16x342xbf16, #tpu.memory_space<vmem>>, vector<8x16xbf16>
    tpu.vector_store %arg8[%c8, %c19_11], %25 {strides = array<i32>} : memref<16x342xbf16, #tpu.memory_space<vmem>>, vector<8x16xbf16>,
    %c0_12 = arith.constant 0 : index
    %c0_13 = arith.constant 0 : index
    %c16 = arith.constant 16 : index
    %27 = vector.load %arg1[%c0_12, %c0_13, %c16] : memref<1x4x256xbf16, #tpu.memory_space<vmem>>, vector<1x4x16xbf16>
    %28 = vector.shape_cast %27 : vector<1x4x16xbf16> to vector<4x16xbf16>
    %c0_14 = arith.constant 0 : index
    %c37 = arith.constant 37 : index
    %29 = vector.load %arg8[%c0_14, %c37] : memref<16x342xbf16, #tpu.memory_space<vmem>>, vector<4x16xbf16>
    tpu.vector_store %arg8[%c0_14, %c37], %28 {strides = array<i32>} : memref<16x342xbf16, #tpu.memory_space<vmem>>, vector<4x16xbf16>,
    %c0_15 = arith.constant 0 : index
    %c0_16 = arith.constant 0 : index
    %c16_17 = arith.constant 16 : index
    %30 = vector.load %arg2[%c0_15, %c0_16, %c16_17] : memref<1x8x256xbf16, #tpu.memory_space<vmem>>, vector<1x8x16xbf16>
    %31 = vector.shape_cast %30 : vector<1x8x16xbf16> to vector<8x16xbf16>
    %c8_18 = arith.constant 8 : index
    %c37_19 = arith.constant 37 : index
    %32 = vector.load %arg8[%c8_18, %c37_19] : memref<16x342xbf16, #tpu.memory_space<vmem>>, vector<8x16xbf16>
    tpu.vector_store %arg8[%c8_18, %c37_19], %31 {strides = array<i32>} : memref<16x342xbf16, #tpu.memory_space<vmem>>, vector<8x16xbf16>,
    %c0_20 = arith.constant 0 : index
    %c0_21 = arith.constant 0 : index
    %c32 = arith.constant 32 : index
    %33 = vector.load %arg1[%c0_20, %c0_21, %c32] : memref<1x4x256xbf16, #tpu.memory_space<vmem>>, vector<1x4x16xbf16>
    %34 = vector.shape_cast %33 : vector<1x4x16xbf16> to vector<4x16xbf16>
    %c0_22 = arith.constant 0 : index
    %c55 = arith.constant 55 : index
    %35 = vector.load %arg8[%c0_22, %c55] : memref<16x342xbf16, #tpu.memory_space<vmem>>, vector<4x16xbf16>
    tpu.vector_store %arg8[%c0_22, %c55], %34 {strides = array<i32>} : memref<16x342xbf16, #tpu.memory_space<vmem>>, vector<4x16xbf16>,
    %c0_23 = arith.constant 0 : index
    %c0_24 = arith.constant 0 : index
    %c32_25 = arith.constant 32 : index
    %36 = vector.load %arg2[%c0_23, %c0_24, %c32_25] : memref<1x8x256xbf16, #tpu.memory_space<vmem>>, vector<1x8x16xbf16>
    %37 = vector.shape_cast %36 : vector<1x8x16xbf16> to vector<8x16xbf16>
    %c8_26 = arith.constant 8 : index
    %c55_27 = arith.constant 55 : index
    %38 = vector.load %arg8[%c8_26, %c55_27] : memref<16x342xbf16, #tpu.memory_space<vmem>>, vector<8x16xbf16>
    tpu.vector_store %arg8[%c8_26, %c55_27], %37 {strides = array<i32>} : memref<16x342xbf16, #tpu.memory_space<vmem>>, vector<8x16xbf16>,
    %c0_28 = arith.constant 0 : index
    %c0_29 = arith.constant 0 : index
    %c48 = arith.constant 48 : index
    %39 = vector.load %arg1[%c0_28, %c0_29, %c48] : memref<1x4x256xbf16, #tpu.memory_space<vmem>>, vector<1x4x16xbf16>
    %40 = vector.shape_cast %39 : vector<1x4x16xbf16> to vector<4x16xbf16>
    %c0_30 = arith.constant 0 : index
    %c73 = arith.constant 73 : index
    %41 = vector.load %arg8[%c0_30, %c73] : memref<16x342xbf16, #tpu.memory_space<vmem>>, vector<4x16xbf16>
    tpu.vector_store %arg8[%c0_30, %c73], %40 {strides = array<i32>} : memref<16x342xbf16, #tpu.memory_space<vmem>>, vector<4x16xbf16>,
    %c0_31 = arith.constant 0 : index
    %c0_32 = arith.constant 0 : index
    %c48_33 = arith.constant 48 : index
    %42 = vector.load %arg2[%c0_31, %c0_32, %c48_33] : memref<1x8x256xbf16, #tpu.memory_space<vmem>>, vector<1x8x16xbf16>
    %43 = vector.shape_cast %42 : vector<1x8x16xbf16> to vector<8x16xbf16>
    %c8_34 = arith.constant 8 : index
    %c73_35 = arith.constant 73 : index
    %44 = vector.load %arg8[%c8_34, %c73_35] : memref<16x342xbf16, #tpu.memory_space<vmem>>, vector<8x16xbf16>
    tpu.vector_store %arg8[%c8_34, %c73_35], %43 {strides = array<i32>} : memref<16x342xbf16, #tpu.memory_space<vmem>>, vector<8x16xbf16>,
    %c0_36 = arith.constant 0 : index
    %c0_37 = arith.constant 0 : index
    %c64 = arith.constant 64 : index
    %45 = vector.load %arg1[%c0_36, %c0_37, %c64] : memref<1x4x256xbf16, #tpu.memory_space<vmem>>, vector<1x4x16xbf16>
    %46 = vector.shape_cast %45 : vector<1x4x16xbf16> to vector<4x16xbf16>
    %c0_38 = arith.constant 0 : index
    %c91 = arith.constant 91 : index
    %47 = vector.load %arg8[%c0_38, %c91] : memref<16x342xbf16, #tpu.memory_space<vmem>>, vector<4x16xbf16>
    tpu.vector_store %arg8[%c0_38, %c91], %46 {strides = array<i32>} : memref<16x342xbf16, #tpu.memory_space<vmem>>, vector<4x16xbf16>,
    %c0_39 = arith.constant 0 : index
    %c0_40 = arith.constant 0 : index
    %c64_41 = arith.constant 64 : index
    %48 = vector.load %arg2[%c0_39, %c0_40, %c64_41] : memref<1x8x256xbf16, #tpu.memory_space<vmem>>, vector<1x8x16xbf16>
    %49 = vector.shape_cast %48 : vector<1x8x16xbf16> to vector<8x16xbf16>
    %c8_42 = arith.constant 8 : index
    %c91_43 = arith.constant 91 : index
    %50 = vector.load %arg8[%c8_42, %c91_43] : memref<16x342xbf16, #tpu.memory_space<vmem>>, vector<8x16xbf16>
    tpu.vector_store %arg8[%c8_42, %c91_43], %49 {strides = array<i32>} : memref<16x342xbf16, #tpu.memory_space<vmem>>, vector<8x16xbf16>,
    %c0_44 = arith.constant 0 : index
    %c0_45 = arith.constant 0 : index
    %c80 = arith.constant 80 : index
    %51 = vector.load %arg1[%c0_44, %c0_45, %c80] : memref<1x4x256xbf16, #tpu.memory_space<vmem>>, vector<1x4x16xbf16>
    %52 = vector.shape_cast %51 : vector<1x4x16xbf16> to vector<4x16xbf16>
    %c0_46 = arith.constant 0 : index
    %c109 = arith.constant 109 : index
    %53 = vector.load %arg8[%c0_46, %c109] : memref<16x342xbf16, #tpu.memory_space<vmem>>, vector<4x16xbf16>
    tpu.vector_store %arg8[%c0_46, %c109], %52 {strides = array<i32>} : memref<16x342xbf16, #tpu.memory_space<vmem>>, vector<4x16xbf16>,
    %c0_47 = arith.constant 0 : index
    %c0_48 = arith.constant 0 : index
    %c80_49 = arith.constant 80 : index
    %54 = vector.load %arg2[%c0_47, %c0_48, %c80_49] : memref<1x8x256xbf16, #tpu.memory_space<vmem>>, vector<1x8x16xbf16>
    %55 = vector.shape_cast %54 : vector<1x8x16xbf16> to vector<8x16xbf16>
    %c8_50 = arith.constant 8 : index
    %c109_51 = arith.constant 109 : index
    %56 = vector.load %arg8[%c8_50, %c109_51] : memref<16x342xbf16, #tpu.memory_space<vmem>>, vector<8x16xbf16>
    tpu.vector_store %arg8[%c8_50, %c109_51], %55 {strides = array<i32>} : memref<16x342xbf16, #tpu.memory_space<vmem>>, vector<8x16xbf16>,
    %c0_52 = arith.constant 0 : index
    %c0_53 = arith.constant 0 : index
    %c96 = arith.constant 96 : index
    %57 = vector.load %arg1[%c0_52, %c0_53, %c96] : memref<1x4x256xbf16, #tpu.memory_space<vmem>>, vector<1x4x16xbf16>
    %58 = vector.shape_cast %57 : vector<1x4x16xbf16> to vector<4x16xbf16>
    %c0_54 = arith.constant 0 : index
    %c127 = arith.constant 127 : index
    %59 = vector.load %arg8[%c0_54, %c127] : memref<16x342xbf16, #tpu.memory_space<vmem>>, vector<4x16xbf16>
    tpu.vector_store %arg8[%c0_54, %c127], %58 {strides = array<i32>} : memref<16x342xbf16, #tpu.memory_space<vmem>>, vector<4x16xbf16>,
    %c0_55 = arith.constant 0 : index
    %c0_56 = arith.constant 0 : index
    %c96_57 = arith.constant 96 : index
    %60 = vector.load %arg2[%c0_55, %c0_56, %c96_57] : memref<1x8x256xbf16, #tpu.memory_space<vmem>>, vector<1x8x16xbf16>
    %61 = vector.shape_cast %60 : vector<1x8x16xbf16> to vector<8x16xbf16>
    %c8_58 = arith.constant 8 : index
    %c127_59 = arith.constant 127 : index
    %62 = vector.load %arg8[%c8_58, %c127_59] : memref<16x342xbf16, #tpu.memory_space<vmem>>, vector<8x16xbf16>
    tpu.vector_store %arg8[%c8_58, %c127_59], %61 {strides = array<i32>} : memref<16x342xbf16, #tpu.memory_space<vmem>>, vector<8x16xbf16>,
    %c0_60 = arith.constant 0 : index
    %c0_61 = arith.constant 0 : index
    %c112 = arith.constant 112 : index
    %63 = vector.load %arg1[%c0_60, %c0_61, %c112] : memref<1x4x256xbf16, #tpu.memory_space<vmem>>, vector<1x4x16xbf16>
    %64 = vector.shape_cast %63 : vector<1x4x16xbf16> to vector<4x16xbf16>
    %c0_62 = arith.constant 0 : index
    %c145 = arith.constant 145 : index
    %65 = vector.load %arg8[%c0_62, %c145] : memref<16x342xbf16, #tpu.memory_space<vmem>>, vector<4x16xbf16>
    tpu.vector_store %arg8[%c0_62, %c145], %64 {strides = array<i32>} : memref<16x342xbf16, #tpu.memory_space<vmem>>, vector<4x16xbf16>,
    %c0_63 = arith.constant 0 : index
    %c0_64 = arith.constant 0 : index
    %c112_65 = arith.constant 112 : index
    %66 = vector.load %arg2[%c0_63, %c0_64, %c112_65] : memref<1x8x256xbf16, #tpu.memory_space<vmem>>, vector<1x8x16xbf16>
    %67 = vector.shape_cast %66 : vector<1x8x16xbf16> to vector<8x16xbf16>
    %c8_66 = arith.constant 8 : index
    %c145_67 = arith.constant 145 : index
    %68 = vector.load %arg8[%c8_66, %c145_67] : memref<16x342xbf16, #tpu.memory_space<vmem>>, vector<8x16xbf16>
    tpu.vector_store %arg8[%c8_66, %c145_67], %67 {strides = array<i32>} : memref<16x342xbf16, #tpu.memory_space<vmem>>, vector<8x16xbf16>,
    %c0_68 = arith.constant 0 : index
    %c0_69 = arith.constant 0 : index
    %c128 = arith.constant 128 : index
    %69 = vector.load %arg1[%c0_68, %c0_69, %c128] : memref<1x4x256xbf16, #tpu.memory_space<vmem>>, vector<1x4x16xbf16>
    %70 = vector.shape_cast %69 : vector<1x4x16xbf16> to vector<4x16xbf16>
    %c0_70 = arith.constant 0 : index
    %c163 = arith.constant 163 : index
    %71 = vector.load %arg8[%c0_70, %c163] : memref<16x342xbf16, #tpu.memory_space<vmem>>, vector<4x16xbf16>
    tpu.vector_store %arg8[%c0_70, %c163], %70 {strides = array<i32>} : memref<16x342xbf16, #tpu.memory_space<vmem>>, vector<4x16xbf16>,
    %c0_71 = arith.constant 0 : index
    %c0_72 = arith.constant 0 : index
    %c128_73 = arith.constant 128 : index
    %72 = vector.load %arg2[%c0_71, %c0_72, %c128_73] : memref<1x8x256xbf16, #tpu.memory_space<vmem>>, vector<1x8x16xbf16>
    %73 = vector.shape_cast %72 : vector<1x8x16xbf16> to vector<8x16xbf16>
    %c8_74 = arith.constant 8 : index
    %c163_75 = arith.constant 163 : index
    %74 = vector.load %arg8[%c8_74, %c163_75] : memref<16x342xbf16, #tpu.memory_space<vmem>>, vector<8x16xbf16>
    tpu.vector_store %arg8[%c8_74, %c163_75], %73 {strides = array<i32>} : memref<16x342xbf16, #tpu.memory_space<vmem>>, vector<8x16xbf16>,
    %c0_76 = arith.constant 0 : index
    %c0_77 = arith.constant 0 : index
    %c144 = arith.constant 144 : index
    %75 = vector.load %arg1[%c0_76, %c0_77, %c144] : memref<1x4x256xbf16, #tpu.memory_space<vmem>>, vector<1x4x16xbf16>
    %76 = vector.shape_cast %75 : vector<1x4x16xbf16> to vector<4x16xbf16>
    %c0_78 = arith.constant 0 : index
    %c181 = arith.constant 181 : index
    %77 = vector.load %arg8[%c0_78, %c181] : memref<16x342xbf16, #tpu.memory_space<vmem>>, vector<4x16xbf16>
    tpu.vector_store %arg8[%c0_78, %c181], %76 {strides = array<i32>} : memref<16x342xbf16, #tpu.memory_space<vmem>>, vector<4x16xbf16>,
    %c0_79 = arith.constant 0 : index
    %c0_80 = arith.constant 0 : index
    %c144_81 = arith.constant 144 : index
    %78 = vector.load %arg2[%c0_79, %c0_80, %c144_81] : memref<1x8x256xbf16, #tpu.memory_space<vmem>>, vector<1x8x16xbf16>
    %79 = vector.shape_cast %78 : vector<1x8x16xbf16> to vector<8x16xbf16>
    %c8_82 = arith.constant 8 : index
    %c181_83 = arith.constant 181 : index
    %80 = vector.load %arg8[%c8_82, %c181_83] : memref<16x342xbf16, #tpu.memory_space<vmem>>, vector<8x16xbf16>
    tpu.vector_store %arg8[%c8_82, %c181_83], %79 {strides = array<i32>} : memref<16x342xbf16, #tpu.memory_space<vmem>>, vector<8x16xbf16>,
    %c0_84 = arith.constant 0 : index
    %c0_85 = arith.constant 0 : index
    %c160 = arith.constant 160 : index
    %81 = vector.load %arg1[%c0_84, %c0_85, %c160] : memref<1x4x256xbf16, #tpu.memory_space<vmem>>, vector<1x4x16xbf16>
    %82 = vector.shape_cast %81 : vector<1x4x16xbf16> to vector<4x16xbf16>
    %c0_86 = arith.constant 0 : index
    %c199 = arith.constant 199 : index
    %83 = vector.load %arg8[%c0_86, %c199] : memref<16x342xbf16, #tpu.memory_space<vmem>>, vector<4x16xbf16>
    tpu.vector_store %arg8[%c0_86, %c199], %82 {strides = array<i32>} : memref<16x342xbf16, #tpu.memory_space<vmem>>, vector<4x16xbf16>,
    %c0_87 = arith.constant 0 : index
    %c0_88 = arith.constant 0 : index
    %c160_89 = arith.constant 160 : index
    %84 = vector.load %arg2[%c0_87, %c0_88, %c160_89] : memref<1x8x256xbf16, #tpu.memory_space<vmem>>, vector<1x8x16xbf16>
    %85 = vector.shape_cast %84 : vector<1x8x16xbf16> to vector<8x16xbf16>
    %c8_90 = arith.constant 8 : index
    %c199_91 = arith.constant 199 : index
    %86 = vector.load %arg8[%c8_90, %c199_91] : memref<16x342xbf16, #tpu.memory_space<vmem>>, vector<8x16xbf16>
    tpu.vector_store %arg8[%c8_90, %c199_91], %85 {strides = array<i32>} : memref<16x342xbf16, #tpu.memory_space<vmem>>, vector<8x16xbf16>,
    %c0_92 = arith.constant 0 : index
    %c0_93 = arith.constant 0 : index
    %c176 = arith.constant 176 : index
    %87 = vector.load %arg1[%c0_92, %c0_93, %c176] : memref<1x4x256xbf16, #tpu.memory_space<vmem>>, vector<1x4x16xbf16>
    %88 = vector.shape_cast %87 : vector<1x4x16xbf16> to vector<4x16xbf16>
    %c0_94 = arith.constant 0 : index
    %c217 = arith.constant 217 : index
    %89 = vector.load %arg8[%c0_94, %c217] : memref<16x342xbf16, #tpu.memory_space<vmem>>, vector<4x16xbf16>
    tpu.vector_store %arg8[%c0_94, %c217], %88 {strides = array<i32>} : memref<16x342xbf16, #tpu.memory_space<vmem>>, vector<4x16xbf16>,
    %c0_95 = arith.constant 0 : index
    %c0_96 = arith.constant 0 : index
    %c176_97 = arith.constant 176 : index
    %90 = vector.load %arg2[%c0_95, %c0_96, %c176_97] : memref<1x8x256xbf16, #tpu.memory_space<vmem>>, vector<1x8x16xbf16>
    %91 = vector.shape_cast %90 : vector<1x8x16xbf16> to vector<8x16xbf16>
    %c8_98 = arith.constant 8 : index
    %c217_99 = arith.constant 217 : index
    %92 = vector.load %arg8[%c8_98, %c217_99] : memref<16x342xbf16, #tpu.memory_space<vmem>>, vector<8x16xbf16>
    tpu.vector_store %arg8[%c8_98, %c217_99], %91 {strides = array<i32>} : memref<16x342xbf16, #tpu.memory_space<vmem>>, vector<8x16xbf16>,
    %c0_100 = arith.constant 0 : index
    %c0_101 = arith.constant 0 : index
    %c192 = arith.constant 192 : index
    %93 = vector.load %arg1[%c0_100, %c0_101, %c192] : memref<1x4x256xbf16, #tpu.memory_space<vmem>>, vector<1x4x16xbf16>
    %94 = vector.shape_cast %93 : vector<1x4x16xbf16> to vector<4x16xbf16>
    %c0_102 = arith.constant 0 : index
    %c235 = arith.constant 235 : index
    %95 = vector.load %arg8[%c0_102, %c235] : memref<16x342xbf16, #tpu.memory_space<vmem>>, vector<4x16xbf16>
    tpu.vector_store %arg8[%c0_102, %c235], %94 {strides = array<i32>} : memref<16x342xbf16, #tpu.memory_space<vmem>>, vector<4x16xbf16>,
    %c0_103 = arith.constant 0 : index
    %c0_104 = arith.constant 0 : index
    %c192_105 = arith.constant 192 : index
    %96 = vector.load %arg2[%c0_103, %c0_104, %c192_105] : memref<1x8x256xbf16, #tpu.memory_space<vmem>>, vector<1x8x16xbf16>
    %97 = vector.shape_cast %96 : vector<1x8x16xbf16> to vector<8x16xbf16>
    %c8_106 = arith.constant 8 : index
    %c235_107 = arith.constant 235 : index
    %98 = vector.load %arg8[%c8_106, %c235_107] : memref<16x342xbf16, #tpu.memory_space<vmem>>, vector<8x16xbf16>
    tpu.vector_store %arg8[%c8_106, %c235_107], %97 {strides = array<i32>} : memref<16x342xbf16, #tpu.memory_space<vmem>>, vector<8x16xbf16>,
    %c0_108 = arith.constant 0 : index
    %c0_109 = arith.constant 0 : index
    %c208 = arith.constant 208 : index
    %99 = vector.load %arg1[%c0_108, %c0_109, %c208] : memref<1x4x256xbf16, #tpu.memory_space<vmem>>, vector<1x4x16xbf16>
    %100 = vector.shape_cast %99 : vector<1x4x16xbf16> to vector<4x16xbf16>
    %c0_110 = arith.constant 0 : index
    %c253 = arith.constant 253 : index
    %101 = vector.load %arg8[%c0_110, %c253] : memref<16x342xbf16, #tpu.memory_space<vmem>>, vector<4x16xbf16>
    tpu.vector_store %arg8[%c0_110, %c253], %100 {strides = array<i32>} : memref<16x342xbf16, #tpu.memory_space<vmem>>, vector<4x16xbf16>,
    %c0_111 = arith.constant 0 : index
    %c0_112 = arith.constant 0 : index
    %c208_113 = arith.constant 208 : index
    %102 = vector.load %arg2[%c0_111, %c0_112, %c208_113] : memref<1x8x256xbf16, #tpu.memory_space<vmem>>, vector<1x8x16xbf16>
    %103 = vector.shape_cast %102 : vector<1x8x16xbf16> to vector<8x16xbf16>
    %c8_114 = arith.constant 8 : index
    %c253_115 = arith.constant 253 : index
    %104 = vector.load %arg8[%c8_114, %c253_115] : memref<16x342xbf16, #tpu.memory_space<vmem>>, vector<8x16xbf16>
    tpu.vector_store %arg8[%c8_114, %c253_115], %103 {strides = array<i32>} : memref<16x342xbf16, #tpu.memory_space<vmem>>, vector<8x16xbf16>,
    %c0_116 = arith.constant 0 : index
    %c0_117 = arith.constant 0 : index
    %c224 = arith.constant 224 : index
    %105 = vector.load %arg1[%c0_116, %c0_117, %c224] : memref<1x4x256xbf16, #tpu.memory_space<vmem>>, vector<1x4x16xbf16>
    %106 = vector.shape_cast %105 : vector<1x4x16xbf16> to vector<4x16xbf16>
    %c0_118 = arith.constant 0 : index
    %c271 = arith.constant 271 : index
    %107 = vector.load %arg8[%c0_118, %c271] : memref<16x342xbf16, #tpu.memory_space<vmem>>, vector<4x16xbf16>
    tpu.vector_store %arg8[%c0_118, %c271], %106 {strides = array<i32>} : memref<16x342xbf16, #tpu.memory_space<vmem>>, vector<4x16xbf16>,
    %c0_119 = arith.constant 0 : index
    %c0_120 = arith.constant 0 : index
    %c224_121 = arith.constant 224 : index
    %108 = vector.load %arg2[%c0_119, %c0_120, %c224_121] : memref<1x8x256xbf16, #tpu.memory_space<vmem>>, vector<1x8x16xbf16>
    %109 = vector.shape_cast %108 : vector<1x8x16xbf16> to vector<8x16xbf16>
    %c8_122 = arith.constant 8 : index
    %c271_123 = arith.constant 271 : index
    %110 = vector.load %arg8[%c8_122, %c271_123] : memref<16x342xbf16, #tpu.memory_space<vmem>>, vector<8x16xbf16>
    tpu.vector_store %arg8[%c8_122, %c271_123], %109 {strides = array<i32>} : memref<16x342xbf16, #tpu.memory_space<vmem>>, vector<8x16xbf16>,
    %c0_124 = arith.constant 0 : index
    %c0_125 = arith.constant 0 : index
    %c240 = arith.constant 240 : index
    %111 = vector.load %arg1[%c0_124, %c0_125, %c240] : memref<1x4x256xbf16, #tpu.memory_space<vmem>>, vector<1x4x16xbf16>
    %112 = vector.shape_cast %111 : vector<1x4x16xbf16> to vector<4x16xbf16>
    %c0_126 = arith.constant 0 : index
    %c289 = arith.constant 289 : index
    %113 = vector.load %arg8[%c0_126, %c289] : memref<16x342xbf16, #tpu.memory_space<vmem>>, vector<4x16xbf16>
    tpu.vector_store %arg8[%c0_126, %c289], %112 {strides = array<i32>} : memref<16x342xbf16, #tpu.memory_space<vmem>>, vector<4x16xbf16>,
    %c0_127 = arith.constant 0 : index
    %c0_128 = arith.constant 0 : index
    %c240_129 = arith.constant 240 : index
    %114 = vector.load %arg2[%c0_127, %c0_128, %c240_129] : memref<1x8x256xbf16, #tpu.memory_space<vmem>>, vector<1x8x16xbf16>
    %115 = vector.shape_cast %114 : vector<1x8x16xbf16> to vector<8x16xbf16>
    %c8_130 = arith.constant 8 : index
    %c289_131 = arith.constant 289 : index
    %116 = vector.load %arg8[%c8_130, %c289_131] : memref<16x342xbf16, #tpu.memory_space<vmem>>, vector<8x16xbf16>
    tpu.vector_store %arg8[%c8_130, %c289_131], %115 {strides = array<i32>} : memref<16x342xbf16, #tpu.memory_space<vmem>>, vector<8x16xbf16>,
    %c0_132 = arith.constant 0 : index
    %c0_133 = arith.constant 0 : index
    %117 = vector.load %arg8[%c0_132, %c0_133] : memref<16x342xbf16, #tpu.memory_space<vmem>>, vector<16x288xbf16>
    %c0_134 = arith.constant 0 : index
    %c0_135 = arith.constant 0 : index
    %118 = vector.load %arg10[%c0_134, %c0_135] : memref<144x288xbf16, #tpu.memory_space<vmem>>, vector<16x288xbf16>
    tpu.vector_store %arg10[%c0_134, %c0_135], %117 {strides = array<i32>} : memref<144x288xbf16, #tpu.memory_space<vmem>>, vector<16x288xbf16>,
    %c0_136 = arith.constant 0 : index
    %c1 = arith.constant 1 : index
    %119 = vector.load %arg8[%c0_136, %c1] : memref<16x342xbf16, #tpu.memory_space<vmem>>, vector<16x288xbf16>
    %c16_137 = arith.constant 16 : index
    %c0_138 = arith.constant 0 : index
    %120 = vector.load %arg10[%c16_137, %c0_138] : memref<144x288xbf16, #tpu.memory_space<vmem>>, vector<16x288xbf16>
    tpu.vector_store %arg10[%c16_137, %c0_138], %119 {strides = array<i32>} : memref<144x288xbf16, #tpu.memory_space<vmem>>, vector<16x288xbf16>,
    %c0_139 = arith.constant 0 : index
    %c2 = arith.constant 2 : index
    %121 = vector.load %arg8[%c0_139, %c2] : memref<16x342xbf16, #tpu.memory_space<vmem>>, vector<16x288xbf16>
    %c32_140 = arith.constant 32 : index
    %c0_141 = arith.constant 0 : index
    %122 = vector.load %arg10[%c32_140, %c0_141] : memref<144x288xbf16, #tpu.memory_space<vmem>>, vector<16x288xbf16>
    tpu.vector_store %arg10[%c32_140, %c0_141], %121 {strides = array<i32>} : memref<144x288xbf16, #tpu.memory_space<vmem>>, vector<16x288xbf16>,
    %c0_142 = arith.constant 0 : index
    %c18 = arith.constant 18 : index
    %123 = vector.load %arg8[%c0_142, %c18] : memref<16x342xbf16, #tpu.memory_space<vmem>>, vector<16x288xbf16>
    %c48_143 = arith.constant 48 : index
    %c0_144 = arith.constant 0 : index
    %124 = vector.load %arg10[%c48_143, %c0_144] : memref<144x288xbf16, #tpu.memory_space<vmem>>, vector<16x288xbf16>
    tpu.vector_store %arg10[%c48_143, %c0_144], %123 {strides = array<i32>} : memref<144x288xbf16, #tpu.memory_space<vmem>>, vector<16x288xbf16>,
    %c0_145 = arith.constant 0 : index
    %c19_146 = arith.constant 19 : index
    %125 = vector.load %arg8[%c0_145, %c19_146] : memref<16x342xbf16, #tpu.memory_space<vmem>>, vector<16x288xbf16>
    %c64_147 = arith.constant 64 : index
    %c0_148 = arith.constant 0 : index
    %126 = vector.load %arg10[%c64_147, %c0_148] : memref<144x288xbf16, #tpu.memory_space<vmem>>, vector<16x288xbf16>
    tpu.vector_store %arg10[%c64_147, %c0_148], %125 {strides = array<i32>} : memref<144x288xbf16, #tpu.memory_space<vmem>>, vector<16x288xbf16>,
    %c0_149 = arith.constant 0 : index
    %c20 = arith.constant 20 : index
    %127 = vector.load %arg8[%c0_149, %c20] : memref<16x342xbf16, #tpu.memory_space<vmem>>, vector<16x288xbf16>
    %c80_150 = arith.constant 80 : index
    %c0_151 = arith.constant 0 : index
    %128 = vector.load %arg10[%c80_150, %c0_151] : memref<144x288xbf16, #tpu.memory_space<vmem>>, vector<16x288xbf16>
    tpu.vector_store %arg10[%c80_150, %c0_151], %127 {strides = array<i32>} : memref<144x288xbf16, #tpu.memory_space<vmem>>, vector<16x288xbf16>,
    %c0_152 = arith.constant 0 : index
    %c36 = arith.constant 36 : index
    %129 = vector.load %arg8[%c0_152, %c36] : memref<16x342xbf16, #tpu.memory_space<vmem>>, vector<16x288xbf16>
    %c96_153 = arith.constant 96 : index
    %c0_154 = arith.constant 0 : index
    %130 = vector.load %arg10[%c96_153, %c0_154] : memref<144x288xbf16, #tpu.memory_space<vmem>>, vector<16x288xbf16>
    tpu.vector_store %arg10[%c96_153, %c0_154], %129 {strides = array<i32>} : memref<144x288xbf16, #tpu.memory_space<vmem>>, vector<16x288xbf16>,
    %c0_155 = arith.constant 0 : index
    %c37_156 = arith.constant 37 : index
    %131 = vector.load %arg8[%c0_155, %c37_156] : memref<16x342xbf16, #tpu.memory_space<vmem>>, vector<16x288xbf16>
    %c112_157 = arith.constant 112 : index
    %c0_158 = arith.constant 0 : index
    %132 = vector.load %arg10[%c112_157, %c0_158] : memref<144x288xbf16, #tpu.memory_space<vmem>>, vector<16x288xbf16>
    tpu.vector_store %arg10[%c112_157, %c0_158], %131 {strides = array<i32>} : memref<144x288xbf16, #tpu.memory_space<vmem>>, vector<16x288xbf16>,
    %c0_159 = arith.constant 0 : index
    %c38 = arith.constant 38 : index
    %133 = vector.load %arg8[%c0_159, %c38] : memref<16x342xbf16, #tpu.memory_space<vmem>>, vector<16x288xbf16>
    %c128_160 = arith.constant 128 : index
    %c0_161 = arith.constant 0 : index
    %134 = vector.load %arg10[%c128_160, %c0_161] : memref<144x288xbf16, #tpu.memory_space<vmem>>, vector<16x288xbf16>
    tpu.vector_store %arg10[%c128_160, %c0_161], %133 {strides = array<i32>} : memref<144x288xbf16, #tpu.memory_space<vmem>>, vector<16x288xbf16>,
    %c0_162 = arith.constant 0 : index
    %c0_163 = arith.constant 0 : index
    %135 = vector.load %arg3[%c0_162, %c0_163] : memref<16x144xbf16, #tpu.memory_space<vmem>>, vector<16x144xbf16>
    %c0_164 = arith.constant 0 : index
    %c0_165 = arith.constant 0 : index
    %136 = vector.load %arg10[%c0_164, %c0_165] : memref<144x288xbf16, #tpu.memory_space<vmem>>, vector<144x288xbf16>
    %cst_166 = arith.constant dense<0.000000e+00> : vector<16x288xf32>
    %137 = tpu.matmul %135, %136, %cst_166 {dimension_numbers = #tpu.dot_dimension_numbers<[1], [0], [0], [1], [0, 0, 1, 1], [], []>} : vector<16x144xbf16>, vector<144x288xbf16>, vector<16x288xf32> -> vector<16x288xf32>
    %c0_167 = arith.constant 0 : index
    %c0_168 = arith.constant 0 : index
    %138 = vector.load %arg5[%c0_167, %c0_168] : memref<16x1xf32, #tpu.memory_space<vmem>>, vector<16x1xf32>
    %139 = vector.broadcast %138 : vector<16x1xf32> to vector<16x288xf32>
    %140 = arith.addf %137, %139 : vector<16x288xf32>
    %cst_169 = arith.constant 0.000000e+00 : f32
    %141 = vector.broadcast %cst_169 : f32 to vector<16x288xf32>
    %142 = arith.cmpf oge, %140, %141 : vector<16x288xf32>
    %cst_170 = arith.constant 0.00999999977 : f32
    %143 = vector.broadcast %cst_170 : f32 to vector<16x288xf32>
    %144 = arith.mulf %143, %140 : vector<16x288xf32>
    %145 = arith.select %142, %140, %144 : vector<16x288xi1>, vector<16x288xf32>
    %cst_171 = arith.constant 0.000000e+00 : bf16
    %146 = vector.broadcast %cst_171 : bf16 to vector<16x342xbf16>
    %c0_172 = arith.constant 0 : index
    %c0_173 = arith.constant 0 : index
    %147 = vector.load %arg9[%c0_172, %c0_173] : memref<16x342xbf16, #tpu.memory_space<vmem>>, vector<16x342xbf16>
    tpu.vector_store %arg9[%c0_172, %c0_173], %146 {strides = array<i32>} : memref<16x342xbf16, #tpu.memory_space<vmem>>, vector<16x342xbf16>,
    %cst_174 = arith.constant 0.000000e+00 : f32
    %148 = vector.shape_cast %18 : vector<1x288xi1> to vector<1x288xi1>
    %149 = vector.broadcast %148 : vector<1x288xi1> to vector<16x288xi1>
    %150 = vector.broadcast %cst_174 : f32 to vector<16x288xf32>
    %151 = arith.select %149, %145, %150 : vector<16x288xi1>, vector<16x288xf32>
    %152 = arith.truncf %151 : vector<16x288xf32> to vector<16x288xbf16>
    %c0_175 = arith.constant 0 : index
    %c19_176 = arith.constant 19 : index
    %153 = vector.load %arg9[%c0_175, %c19_176] : memref<16x342xbf16, #tpu.memory_space<vmem>>, vector<16x288xbf16>
    tpu.vector_store %arg9[%c0_175, %c19_176], %152 {strides = array<i32>} : memref<16x342xbf16, #tpu.memory_space<vmem>>, vector<16x288xbf16>,
    %c0_177 = arith.constant 0 : index
    %c0_178 = arith.constant 0 : index
    %154 = vector.load %arg9[%c0_177, %c0_178] : memref<16x342xbf16, #tpu.memory_space<vmem>>, vector<16x288xbf16>
    %c0_179 = arith.constant 0 : index
    %c0_180 = arith.constant 0 : index
    %155 = vector.load %arg10[%c0_179, %c0_180] : memref<144x288xbf16, #tpu.memory_space<vmem>>, vector<16x288xbf16>
    tpu.vector_store %arg10[%c0_179, %c0_180], %154 {strides = array<i32>} : memref<144x288xbf16, #tpu.memory_space<vmem>>, vector<16x288xbf16>,
    %c0_181 = arith.constant 0 : index
    %c1_182 = arith.constant 1 : index
    %156 = vector.load %arg9[%c0_181, %c1_182] : memref<16x342xbf16, #tpu.memory_space<vmem>>, vector<16x288xbf16>
    %c16_183 = arith.constant 16 : index
    %c0_184 = arith.constant 0 : index
    %157 = vector.load %arg10[%c16_183, %c0_184] : memref<144x288xbf16, #tpu.memory_space<vmem>>, vector<16x288xbf16>
    tpu.vector_store %arg10[%c16_183, %c0_184], %156 {strides = array<i32>} : memref<144x288xbf16, #tpu.memory_space<vmem>>, vector<16x288xbf16>,
    %c0_185 = arith.constant 0 : index
    %c2_186 = arith.constant 2 : index
    %158 = vector.load %arg9[%c0_185, %c2_186] : memref<16x342xbf16, #tpu.memory_space<vmem>>, vector<16x288xbf16>
    %c32_187 = arith.constant 32 : index
    %c0_188 = arith.constant 0 : index
    %159 = vector.load %arg10[%c32_187, %c0_188] : memref<144x288xbf16, #tpu.memory_space<vmem>>, vector<16x288xbf16>
    tpu.vector_store %arg10[%c32_187, %c0_188], %158 {strides = array<i32>} : memref<144x288xbf16, #tpu.memory_space<vmem>>, vector<16x288xbf16>,
    %c0_189 = arith.constant 0 : index
    %c18_190 = arith.constant 18 : index
    %160 = vector.load %arg9[%c0_189, %c18_190] : memref<16x342xbf16, #tpu.memory_space<vmem>>, vector<16x288xbf16>
    %c48_191 = arith.constant 48 : index
    %c0_192 = arith.constant 0 : index
    %161 = vector.load %arg10[%c48_191, %c0_192] : memref<144x288xbf16, #tpu.memory_space<vmem>>, vector<16x288xbf16>
    tpu.vector_store %arg10[%c48_191, %c0_192], %160 {strides = array<i32>} : memref<144x288xbf16, #tpu.memory_space<vmem>>, vector<16x288xbf16>,
    %c0_193 = arith.constant 0 : index
    %c19_194 = arith.constant 19 : index
    %162 = vector.load %arg9[%c0_193, %c19_194] : memref<16x342xbf16, #tpu.memory_space<vmem>>, vector<16x288xbf16>
    %c64_195 = arith.constant 64 : index
    %c0_196 = arith.constant 0 : index
    %163 = vector.load %arg10[%c64_195, %c0_196] : memref<144x288xbf16, #tpu.memory_space<vmem>>, vector<16x288xbf16>
    tpu.vector_store %arg10[%c64_195, %c0_196], %162 {strides = array<i32>} : memref<144x288xbf16, #tpu.memory_space<vmem>>, vector<16x288xbf16>,
    %c0_197 = arith.constant 0 : index
    %c20_198 = arith.constant 20 : index
    %164 = vector.load %arg9[%c0_197, %c20_198] : memref<16x342xbf16, #tpu.memory_space<vmem>>, vector<16x288xbf16>
    %c80_199 = arith.constant 80 : index
    %c0_200 = arith.constant 0 : index
    %165 = vector.load %arg10[%c80_199, %c0_200] : memref<144x288xbf16, #tpu.memory_space<vmem>>, vector<16x288xbf16>
    tpu.vector_store %arg10[%c80_199, %c0_200], %164 {strides = array<i32>} : memref<144x288xbf16, #tpu.memory_space<vmem>>, vector<16x288xbf16>,
    %c0_201 = arith.constant 0 : index
    %c36_202 = arith.constant 36 : index
    %166 = vector.load %arg9[%c0_201, %c36_202] : memref<16x342xbf16, #tpu.memory_space<vmem>>, vector<16x288xbf16>
    %c96_203 = arith.constant 96 : index
    %c0_204 = arith.constant 0 : index
    %167 = vector.load %arg10[%c96_203, %c0_204] : memref<144x288xbf16, #tpu.memory_space<vmem>>, vector<16x288xbf16>
    tpu.vector_store %arg10[%c96_203, %c0_204], %166 {strides = array<i32>} : memref<144x288xbf16, #tpu.memory_space<vmem>>, vector<16x288xbf16>,
    %c0_205 = arith.constant 0 : index
    %c37_206 = arith.constant 37 : index
    %168 = vector.load %arg9[%c0_205, %c37_206] : memref<16x342xbf16, #tpu.memory_space<vmem>>, vector<16x288xbf16>
    %c112_207 = arith.constant 112 : index
    %c0_208 = arith.constant 0 : index
    %169 = vector.load %arg10[%c112_207, %c0_208] : memref<144x288xbf16, #tpu.memory_space<vmem>>, vector<16x288xbf16>
    tpu.vector_store %arg10[%c112_207, %c0_208], %168 {strides = array<i32>} : memref<144x288xbf16, #tpu.memory_space<vmem>>, vector<16x288xbf16>,
    %c0_209 = arith.constant 0 : index
    %c38_210 = arith.constant 38 : index
    %170 = vector.load %arg9[%c0_209, %c38_210] : memref<16x342xbf16, #tpu.memory_space<vmem>>, vector<16x288xbf16>
    %c128_211 = arith.constant 128 : index
    %c0_212 = arith.constant 0 : index
    %171 = vector.load %arg10[%c128_211, %c0_212] : memref<144x288xbf16, #tpu.memory_space<vmem>>, vector<16x288xbf16>
    tpu.vector_store %arg10[%c128_211, %c0_212], %170 {strides = array<i32>} : memref<144x288xbf16, #tpu.memory_space<vmem>>, vector<16x288xbf16>,
    %c0_213 = arith.constant 0 : index
    %c0_214 = arith.constant 0 : index
    %172 = vector.load %arg4[%c0_213, %c0_214] : memref<16x144xbf16, #tpu.memory_space<vmem>>, vector<16x144xbf16>
    %c0_215 = arith.constant 0 : index
    %c0_216 = arith.constant 0 : index
    %173 = vector.load %arg10[%c0_215, %c0_216] : memref<144x288xbf16, #tpu.memory_space<vmem>>, vector<144x288xbf16>
    %cst_217 = arith.constant dense<0.000000e+00> : vector<16x288xf32>
    %174 = tpu.matmul %172, %173, %cst_217 {dimension_numbers = #tpu.dot_dimension_numbers<[1], [0], [0], [1], [0, 0, 1, 1], [], []>} : vector<16x144xbf16>, vector<144x288xbf16>, vector<16x288xf32> -> vector<16x288xf32>
    %c0_218 = arith.constant 0 : index
    %c0_219 = arith.constant 0 : index
    %175 = vector.load %arg6[%c0_218, %c0_219] : memref<16x1xf32, #tpu.memory_space<vmem>>, vector<16x1xf32>
    %176 = vector.broadcast %175 : vector<16x1xf32> to vector<16x288xf32>
    %177 = arith.addf %174, %176 : vector<16x288xf32>
    %cst_220 = arith.constant 0.000000e+00 : f32
    %178 = vector.broadcast %cst_220 : f32 to vector<16x288xf32>
    %179 = arith.cmpf oge, %177, %178 : vector<16x288xf32>
    %cst_221 = arith.constant 0.00999999977 : f32
    %180 = vector.broadcast %cst_221 : f32 to vector<16x288xf32>
    %181 = arith.mulf %180, %177 : vector<16x288xf32>
    %182 = arith.select %179, %177, %181 : vector<16x288xi1>, vector<16x288xf32>
    %183 = vector.shape_cast %182 : vector<16x288xf32> to vector<1x16x288xf32>
    %c0_222 = arith.constant 0 : index
    %c0_223 = arith.constant 0 : index
    %c0_224 = arith.constant 0 : index
    %184 = vector.load %arg7[%c0_222, %c0_223, %c0_224] : memref<1x16x288xf32, #tpu.memory_space<vmem>>, vector<1x16x288xf32>
    tpu.vector_store %arg7[%c0_222, %c0_223, %c0_224], %183 {strides = array<i32>} : memref<1x16x288xf32, #tpu.memory_space<vmem>>, vector<1x16x288xf32>,
    return
  }
  func.func @transform_0(%arg0: i32) -> (i32, i32, i32) {
    %c0_i32 = arith.constant 0 : i32
    %c0_i32_0 = arith.constant 0 : i32
    %c0_i32_1 = arith.constant 0 : i32
    return %arg0, %c0_i32, %c0_i32_0 : i32, i32, i32
  }
  func.func @transform_1(%arg0: i32) -> (i32, i32, i32) {
    %c0_i32 = arith.constant 0 : i32
    %c0_i32_0 = arith.constant 0 : i32
    %c0_i32_1 = arith.constant 0 : i32
    return %arg0, %c0_i32, %c0_i32_0 : i32, i32, i32
  }
  func.func @transform_2(%arg0: i32) -> (i32, i32) {
    %c0_i32 = arith.constant 0 : i32
    %c0_i32_0 = arith.constant 0 : i32
    %c0_i32_1 = arith.constant 0 : i32
    return %c0_i32, %c0_i32_0 : i32, i32
  }
  func.func @transform_3(%arg0: i32) -> (i32, i32) {
    %c0_i32 = arith.constant 0 : i32
    %c0_i32_0 = arith.constant 0 : i32
    %c0_i32_1 = arith.constant 0 : i32
    return %c0_i32, %c0_i32_0 : i32, i32
  }
  func.func @transform_4(%arg0: i32) -> (i32, i32) {
    %c0_i32 = arith.constant 0 : i32
    %c0_i32_0 = arith.constant 0 : i32
    %c0_i32_1 = arith.constant 0 : i32
    return %c0_i32, %c0_i32_0 : i32, i32
  }
  func.func @transform_5(%arg0: i32) -> (i32, i32) {
    %c0_i32 = arith.constant 0 : i32
    %c0_i32_0 = arith.constant 0 : i32
    %c0_i32_1 = arith.constant 0 : i32
    return %c0_i32, %c0_i32_0 : i32, i32
  }
  func.func @transform_6(%arg0: i32) -> (i32, i32, i32) {
    %c0_i32 = arith.constant 0 : i32
    %c0_i32_0 = arith.constant 0 : i32
    %c0_i32_1 = arith.constant 0 : i32
    return %arg0, %c0_i32, %c0_i32_0 : i32, i32, i32
  }
}

</mosaic_0001>

<bundles_post_ra>
// kernel: upsample_bn_forward.1
= control target key start
LH: loop header
LB: loop body
LE: loop exit
PB: predicated region body
PF: predicated region fallthrough
CT: control target
= control target key end

     0   :  { %s2209_s21 = smov 0   ;;  %s2630_s0 = inlined_call_operand.vmem [shape: bf16[2,4,256], index: 0, kind: input, shape index: {}]   ;;  %s2631_s1 = inlined_call_operand.vmem [shape: bf16[2,8,256], index: 1, kind: input, shape index: {}]   ;;  %s2632_s2 = inlined_call_operand.vmem [shape: bf16[16,144], index: 2, kind: input, shape index: {}]   ;;  %s2633_s3 = inlined_call_operand.vmem [shape: bf16[16,144], index: 3, kind: input, shape index: {}]   ;;  %s2634_s4 = inlined_call_operand.vmem [shape: f32[16,1], index: 4, kind: input, shape index: {}]   ;;  %s2635_s5 = inlined_call_operand.vmem [shape: f32[16,1], index: 5, kind: input, shape index: {}]   ;;  %s2636_s6 = inlined_call_operand.vmem [shape: f32[2,16,288], index: 6, kind: output, shape index: {}]  }
   0x1 LB: > { %s1975_s22 = sadd.s32 4294967295, %s2147_s21   ;;  %p1979_p0 = scmp.ge.s32.totalorder %s2147_s21, 1  ;;  %s2147_s21 = sphi %s2209_s21, %s16_s21  }
   0x2   : > { %p222_p1 = scmp.lt.s32.totalorder %s2147_s21, 3 }
   0x4   : > { %p223_p2 = pnand %p1979_p0, %p222_p1 }
   0x5   : > { %p257_p3 = scmp.lt.s32.totalorder (!%p223_p2), %s1975_s22, 1  ;;  %s2150_s7 = smov (!%p223_p2), 21  }
   0x6   : > { %226 = sbr.rel (%p223_p2) target bundleno = 1107 (0x453), region = 44  ;;  %s2151_s8 = smov (!%p223_p2), 19  }
   0x7   : > { %s2152_s9 = smov (!%p223_p2), 23   ;;  %s2153_s10 = smov (!%p223_p2), 25  }
   0x8   : > { %s2154_s11 = smov (!%p223_p2), 31   ;;  %s2155_s12 = smov (!%p223_p2), 27  }
   0x9   : > { %s2156_s13 = smov (!%p223_p2), 29   ;;  %s2157_s14 = smov (!%p223_p2), 33  }
   0xa   : > { %s2158_s15 = smov (!%p223_p2), 35   ;;  %s2159_s16 = smov (!%p223_p2), 37  }
   0xb   : > { %v2149_v0 = vmov 0   ;;  %s2662_s22 = smov (!%p257_p3, %s1975_s22), 1  ;;  %vm329_vm0 = vcmask 699392   ;;  %s2160_s17 = smov 39   ;;  %vm345_vm1 = vcmask 279704   ;;  %vm366_vm2 = vcmask 427304  }
   0xc   : > { %328 = vst [vmem:[#allocation2] sm:$0xff] %v2149_v0  ;;  %331 = vst [vmem:[#allocation2 + $0xc] sm:$0xff] %v2149_v0  ;;  %1211 = vmatprep.subr.bf16.mxu1 %v2149_v0  ;;  %2115 = vset.pattern.permute.xlu0 %v2149_v0  ;;  %s2069_s23 = sshll.u32 %s2662_s22, 2  ;;  %s2070_s24 = sshll.u32 %s2662_s22, 3  ;;  %vm352_vm3 = vcmask 281752   ;;  %vm373_vm4 = vcmask 429352  }
   0xd   : > { %1270 = vst [vmem:[#allocation3] sm:$0xff] %v2149_v0  ;;  %1272 = vst [vmem:[#allocation3 + $0xc] sm:$0xff] %v2149_v0  ;;  %2116 = vset.pattern.permute.xlu1 %v2149_v0  ;;  %s2231_s27 = scalar_lea.vmem %s2630_s0, %s2069_s23  ;;  %s2236_s30 = scalar_lea.vmem %s2631_s1, %s2070_s24  ;;  %vm394_vm5 = vcmask 576952   ;;  %vm387_vm6 = vcmask 574904   ;;  %vm415_vm7 = vcmask 724552   ;;  %vm408_vm8 = vcmask 722504  }
   0xe   : > { %v1986_v1 = vld.sshfl [vmem:[%s2231_s27] sm:$0x3 pattern:$0x76325410]  ;;  %v524_v10 = vld [vmem:[%s2236_s30 + $0x4] sm:$0xf] }
   0xf   : > { %363 = vrot.lane.b32.xlu1 %v1986_v1, %s2150_s7  ;;  %342 = vrot.lane.b32.xlu0 %v1986_v1, %s2151_s8  ;;  %v368_v2 = vld [vmem:[%s2236_s30] sm:$0xf]  ;;  %v545_v12 = vld [vmem:[%s2236_s30 + $0x4] sm:$0xf]  ;;  %330 = vst.msk [vmem:[#allocation2 + $0x8] sm:$0xf] %vm329_vm0, %v2149_v0 }
  0x10   : > { %v347_v3 = vld [vmem:[%s2236_s30] sm:$0xf]  ;;  %332 = vst.msk [vmem:[#allocation2 + $0x14] sm:$0xf] %vm329_vm0, %v2149_v0  ;;  %1271 = vst.msk [vmem:[#allocation3 + $0x8] sm:$0xf] %vm329_vm0, %v2149_v0 }
  0x11   : > { %v389_v4 = vld [vmem:[%s2236_s30] sm:$0xf]  ;;  %1273 = vst.msk [vmem:[#allocation3 + $0x14] sm:$0xf] %vm329_vm0, %v2149_v0  ;;  %v566_v13 = vld [vmem:[%s2236_s30 + $0x4] sm:$0xf] }
  0x12   : > { %v410_v5 = vld [vmem:[%s2236_s30] sm:$0xf]  ;;  %v634_v14 = vld [vmem:[%s2236_s30 + $0x4] sm:$0xf]  ;;  %s2161_s18 = smov 45   ;;  %s2162_s19 = smov 41  }
  0x13   : > { %370 = vrot.lane.b32.xlu1 %v368_v2, %s2150_s7  ;;  %349 = vrot.lane.b32.xlu0 %v347_v3, %s2151_s8  ;;  %v478_v6 = vld [vmem:[%s2236_s30] sm:$0xf]  ;;  %v587_v15 = vld [vmem:[%s2236_s30 + $0x4] sm:$0xf]  ;;  %s2163_s20 = smov 43   ;;  %s2164_s23 = smov 47  }
  0x14   : > { %v431_v7 = vld [vmem:[%s2236_s30] sm:$0xf]  ;;  %v608_v16 = vld [vmem:[%s2236_s30 + $0x4] sm:$0xf]  ;;  %s2165_s24 = smov 49   ;;  %vm436_vm9 = vcmask 872152  }
  0x15   : > { %v452_v8 = vld [vmem:[%s2236_s30] sm:$0xf]  ;;  %v659_v17 = vld [vmem:[%s2236_s30 + $0x4] sm:$0xf]  ;;  %vm429_vm10 = vcmask 870104   ;;  %vm485_vm11 = vcmask 1044472  }
  0x16   : > { %v503_v9 = vld [vmem:[%s2236_s30] sm:$0xf]  ;;  %v680_v18 = vld [vmem:[%s2236_s30 + $0x4] sm:$0xf]  ;;  %vm486_vm12 = vcmask 121860   ;;  %vm474_vm13 = vcmask 1042424  }
  0x17   : > { %391 = vrot.lane.b32.xlu1 %v389_v4, %s2152_s9  ;;  %384 = vrot.lane.b32.xlu0 %v1986_v1, %s2152_s9  ;;  %v1993_v11 = vld.sshfl [vmem:[%s2231_s27 + $0x2] sm:$0x3 pattern:$0x76325410]  ;;  %vm475_vm14 = vcmask 119812   ;;  %vm471_vm15 = vcmask 252928  }
  0x18   : > { %vm457_vm0 = vcmask 1019752   ;;  %s2166_s25 = smov 91   ;;  %s2167_s26 = smov 92  }
  0x19   : > { %s2168_s27 = smov 108   ;;  %s2169_s28 = smov 109  }
  0x1a   : > { %s2170_s29 = smov 110   ;;  %s2171_s30 = smov 126  }
  0x1b   : > { %412 = vrot.lane.b32.xlu1 %v410_v5, %s2153_s10  ;;  %405 = vrot.lane.b32.xlu0 %v1986_v1, %s2153_s10  ;;  %s2172_s7 = smov 127   ;;  %s2173_s9 = smov 90  }
  0x1f   : > { %480 = vrot.lane.b32.xlu1 %v478_v6, %s2154_s11  ;;  %468 = vrot.lane.b32.xlu0 %v1986_v1, %s2154_s11 }
  0x23   : > { %433 = vrot.lane.b32.xlu1 %v431_v7, %s2155_s12  ;;  %426 = vrot.lane.b32.xlu0 %v1986_v1, %s2155_s12 }
  0x27   : > { %454 = vrot.lane.b32.xlu1 %v452_v8, %s2156_s13  ;;  %447 = vrot.lane.b32.xlu0 %v1986_v1, %s2156_s13 }
  0x2b   : > { %505 = vrot.lane.b32.xlu1 %v503_v9, %s2157_s14  ;;  %498 = vrot.lane.b32.xlu0 %v1986_v1, %s2157_s14 }
  0x2f   : > { %526 = vrot.lane.b32.xlu1 %v524_v10, %s2158_s15  ;;  %519 = vrot.lane.b32.xlu0 %v1993_v11, %s2158_s15 }
  0x33   : > { %547 = vrot.lane.b32.xlu1 %v545_v12, %s2159_s16  ;;  %540 = vrot.lane.b32.xlu0 %v1993_v11, %s2159_s16 }
  0x37   : > { %568 = vrot.lane.b32.xlu1 %v566_v13, %s2160_s17  ;;  %561 = vrot.lane.b32.xlu0 %v1993_v11, %s2160_s17 }
  0x3b   : > { %636 = vrot.lane.b32.xlu1 %v634_v14, %s2161_s18  ;;  %624 = vrot.lane.b32.xlu0 %v1993_v11, %s2161_s18 }
  0x3f   : > { %589 = vrot.lane.b32.xlu1 %v587_v15, %s2162_s19  ;;  %582 = vrot.lane.b32.xlu0 %v1993_v11, %s2162_s19 }
  0x43   : > { %610 = vrot.lane.b32.xlu1 %v608_v16, %s2163_s20  ;;  %603 = vrot.lane.b32.xlu0 %v1993_v11, %s2163_s20 }
  0x47   : > { %661 = vrot.lane.b32.xlu1 %v659_v17, %s2164_s23  ;;  %654 = vrot.lane.b32.xlu0 %v1993_v11, %s2164_s23  ;;  %v2128_v17 = vld [vmem:[%s2632_s2 + $0x4] ss:$8 sps:$4 sm:$0xff]  }
  0x4b   : > { %682 = vrot.lane.b32.xlu1 %v680_v18, %s2165_s24  ;;  %675 = vrot.lane.b32.xlu0 %v1993_v11, %s2165_s24 }
  0x81   : > { %v364_v19 = vpop.permute.xlu1 %363  ;;  %v343_v20 = vpop.permute.xlu0 %342 }
  0x82   : > { %346 = vst.msk [vmem:[#allocation2] sm:$0x3] %vm345_vm1, %v343_v20  ;;  %vm487_vm1 = vmor %vm486_vm12, %vm485_vm11  ;;  %vm564_vm11 = vcmask 706104   ;;  %vm592_vm12 = vcmask 855752   ;;  %v1000_v20 = vld [vmem:[%s2634_s4 + $0x8] sm:$0xff] }
  0x83   : > { %367 = vst.msk [vmem:[#allocation2] sm:$0x3] %vm366_vm2, %v364_v19  ;;  %vm450_vm2 = vcmask 1017704   ;;  %v999_v19 = vld [vmem:[%s2634_s4] sm:$0xff] }
  0x85   : > { %v371_v21 = vpop.permute.xlu1 %370  ;;  %v350_v22 = vpop.permute.xlu0 %349 }
  0x86   : > { %353 = vst.msk [vmem:[#allocation2 + $0xc] sm:$0xf] %vm352_vm3, %v350_v22  ;;  %vm476_vm3 = vmor %vm475_vm14, %vm474_vm13  ;;  %vm585_vm13 = vcmask 853704   ;;  %vm641_vm14 = vcmask 1044456  }
  0x87   : > { %374 = vst.msk [vmem:[#allocation2 + $0xc] sm:$0xf] %vm373_vm4, %v371_v21  ;;  %vm508_vm4 = vcmask 265352  }
  0x89   : > { %v392_v23 = vpop.permute.xlu1 %391  ;;  %v385_v24 = vpop.permute.xlu0 %384 }
  0x8a   : > { %395 = vst.msk [vmem:[#allocation2 + $0xc] sm:$0xf] %vm394_vm5, %v392_v23  ;;  %vm501_vm5 = vcmask 263304  }
  0x8b   : > { %388 = vst.msk [vmem:[#allocation2] sm:$0x3] %vm387_vm6, %v385_v24  ;;  %vm529_vm6 = vcmask 412952  }
  0x8d   : > { %v413_v25 = vpop.permute.xlu1 %412  ;;  %v406_v26 = vpop.permute.xlu0 %405 }
  0x8e   : > { %416 = vst.msk [vmem:[#allocation2 + $0xc] sm:$0xf] %vm415_vm7, %v413_v25  ;;  %vm522_vm7 = vcmask 410904  }
  0x8f   : > { %409 = vst.msk [vmem:[#allocation2] sm:$0x3] %vm408_vm8, %v406_v26  ;;  %vm550_vm8 = vcmask 560552  }
  0x91   : > { %v481_v27 = vpop.permute.xlu1 %480  ;;  %v469_v28 = vpop.permute.xlu0 %468 }
  0x92   : > { %v482_v31 = vrot.slane %v481_v27, 4  ;;  %v470_v32 = vrot.slane %v469_v28, 4 }
  0x94   : > { %v483_v35 = vsel %vm471_vm15, %v482_v31, %v481_v27  ;;  %v472_v36 = vsel %vm471_vm15, %v470_v32, %v469_v28  ;;  %vm642_vm15 = vcmask 105476  }
  0x95   : > { %v434_v29 = vpop.permute.xlu1 %433  ;;  %v427_v30 = vpop.permute.xlu0 %426 }
  0x96   : > { %437 = vst.msk [vmem:[#allocation2 + $0xc] sm:$0xf] %vm436_vm9, %v434_v29  ;;  %vm543_vm9 = vcmask 558504  }
  0x97   : > { %430 = vst.msk [vmem:[#allocation2] sm:$0x3] %vm429_vm10, %v427_v30  ;;  %vm571_vm10 = vcmask 708152  }
  0x99   : > { %v455_v33 = vpop.permute.xlu1 %454  ;;  %v448_v34 = vpop.permute.xlu0 %447 }
  0x9a   : > { %458 = vst.msk [vmem:[#allocation2 + $0xc] sm:$0xf] %vm457_vm0, %v455_v33  ;;  %vm630_vm0 = vcmask 1042408  }
  0x9b   : > { %451 = vst.msk [vmem:[#allocation2] sm:$0x3] %vm450_vm2, %v448_v34  ;;  %vm627_vm2 = vcmask 367616  }
  0x9c   : > { %488 = vst.msk [vmem:[#allocation2 + $0xc] sm:$0xff] %vm487_vm1, %v483_v35  ;;  %vm631_vm1 = vcmask 103428  }
  0x9d   : > { %477 = vst.msk [vmem:[#allocation2] sm:$0x33] %vm476_vm3, %v472_v36  ;;  %v506_v37 = vpop.permute.xlu1 %505  ;;  %v499_v38 = vpop.permute.xlu0 %498  ;;  %vm613_vm3 = vcmask 1003352  }
  0x9e   : > { %509 = vst.msk [vmem:[#allocation2 + $0x10] sm:$0xf] %vm508_vm4, %v506_v37  ;;  %vm643_vm4 = vmor %vm642_vm15, %vm641_vm14  ;;  %vm916_vm14 = vcmask 744448   ;;  %vm883_vm15 = vcmask 752640  }
  0x9f   : > { %502 = vst.msk [vmem:[#allocation2 + $0x4] sm:$0x3] %vm501_vm5, %v499_v38  ;;  %vm606_vm5 = vcmask 1001304  }
  0xa1   : > { %v527_v39 = vpop.permute.xlu1 %526  ;;  %v520_v40 = vpop.permute.xlu0 %519 }
  0xa2   : > { %530 = vst.msk [vmem:[#allocation2 + $0x10] sm:$0xf] %vm529_vm6, %v527_v39  ;;  %vm632_vm6 = vmor %vm631_vm1, %vm630_vm0  ;;  %vm850_vm0 = vcmask 883712   ;;  %vm817_vm1 = vcmask 891904  }
  0xa3   : > { %523 = vst.msk [vmem:[#allocation2 + $0x4] sm:$0x3] %vm522_vm7, %v520_v40  ;;  %vm664_vm7 = vcmask 248952  }
  0xa5   : > { %v548_v41 = vpop.permute.xlu1 %547  ;;  %v541_v42 = vpop.permute.xlu0 %540 }
  0xa6   : > { %551 = vst.msk [vmem:[#allocation2 + $0x10] sm:$0xf] %vm550_vm8, %v548_v41  ;;  %vm657_vm8 = vcmask 246904  }
  0xa7   : > { %544 = vst.msk [vmem:[#allocation2 + $0x4] sm:$0x3] %vm543_vm9, %v541_v42  ;;  %vm685_vm9 = vcmask 396552  }
  0xa9   : > { %v569_v43 = vpop.permute.xlu1 %568  ;;  %v562_v44 = vpop.permute.xlu0 %561 }
  0xaa   : > { %572 = vst.msk [vmem:[#allocation2 + $0x10] sm:$0xf] %vm571_vm10, %v569_v43  ;;  %vm678_vm10 = vcmask 394504  }
  0xab   : > { %565 = vst.msk [vmem:[#allocation2 + $0x4] sm:$0x3] %vm564_vm11, %v562_v44  ;;  %vm692_vm11 = vcmask 257024  }
  0xad   : > { %v637_v45 = vpop.permute.xlu1 %636  ;;  %v625_v46 = vpop.permute.xlu0 %624 }
  0xae   : > { %v638_v49 = vrot.slane %v637_v45, 4  ;;  %v626_v50 = vrot.slane %v625_v46, 4 }
  0xb0   : > { %v639_v53 = vsel %vm627_vm2, %v638_v49, %v637_v45  ;;  %v628_v54 = vsel %vm627_vm2, %v626_v50, %v625_v46  ;;  %vm2640_vm2 = vcmask 900096  }
  0xb1   : > { %v590_v47 = vpop.permute.xlu1 %589  ;;  %v583_v48 = vpop.permute.xlu0 %582 }
  0xb2   : > { %593 = vst.msk [vmem:[#allocation2 + $0x10] sm:$0xf] %vm592_vm12, %v590_v47  ;;  %vm1164_vm12 = vcmask 130048  }
  0xb3   : > { %586 = vst.msk [vmem:[#allocation2 + $0x4] sm:$0x3] %vm585_vm13, %v583_v48  ;;  %2030 = vmatprep.mubr.msk.bf16.mxu0 %vm1164_vm12, %v2128_v17  ;;  %2031 = vmatprep.mubr.msk.bf16.mxu1 %vm1164_vm12, %v2128_v17  ;;  %vm716_vm13 = vcmask 1043456  }
  0xb5   : > { %v611_v51 = vpop.permute.xlu1 %610  ;;  %v604_v52 = vpop.permute.xlu0 %603 }
  0xb6   : > { %614 = vst.msk [vmem:[#allocation2 + $0x10] sm:$0xf] %vm613_vm3, %v611_v51  ;;  %vm2639_vm3 = vcmask 1031168  }
  0xb7   : > { %607 = vst.msk [vmem:[#allocation2 + $0x4] sm:$0x3] %vm606_vm5, %v604_v52  ;;  %vm2637_vm5 = vcmask 736256  }
  0xb8   : > { %644 = vst.msk [vmem:[#allocation2 + $0x10] sm:$0xff] %vm643_vm4, %v639_v53  ;;  %vm2638_vm4 = vcmask 1039360  }
  0xb9   : > { %633 = vst.msk [vmem:[#allocation2 + $0x4] sm:$0x33] %vm632_vm6, %v628_v54  ;;  %v662_v55 = vpop.permute.xlu1 %661  ;;  %v655_v56 = vpop.permute.xlu0 %654 }
  0xba   : > { %665 = vst.msk [vmem:[#allocation2 + $0x14] sm:$0xf] %vm664_vm7, %v662_v55 }
  0xbb   : > { %658 = vst.msk [vmem:[#allocation2 + $0x8] sm:$0x3] %vm657_vm8, %v655_v56 }
  0xbd   : > { %v683_v57 = vpop.permute.xlu1 %682  ;;  %v676_v58 = vpop.permute.xlu0 %675 }
  0xbe   : > { %686 = vst.msk [vmem:[#allocation2 + $0x14] sm:$0xf] %vm685_vm9, %v683_v57 }
  0xbf   : > { %v2262_v59 = vld [vmem:[#allocation2 + $0xc] sm:$0xff]  ;;  %679 = vst.msk [vmem:[#allocation2 + $0x8] sm:$0x3] %vm678_vm10, %v676_v58 }
  0xc0   : > { %v2264_v60 = vld [vmem:[#allocation2] sm:$0xff] }
  0xc1   : > { %903 = vrot.lane.b32.xlu0 %v2264_v60, %s2166_s25  ;;  %v2004_v61 = vcombine.high %v2264_v60, %v2262_v59  ;;  %v2003_v62 = vcombine.low %v2264_v60, %v2262_v59 }
  0xc5   : > { %907 = vrot.lane.b32.xlu0 %v2262_v59, %s2166_s25  ;;  %v690_v63 = vld [vmem:[#allocation2 + $0x14] sm:$0xf] }
  0xc6   : > { %v688_v1 = vld [vmem:[#allocation2 + $0x8] sm:$0xf]  ;;  %695 = vst.msk [vmem:[#allocation4 + $0x14] sm:$0xf] %vm692_vm11, %v690_v63  ;;  %v898_v3 = vld [vmem:[#allocation2 + $0x14] sm:$0xf] }
  0xc7   : > { %v896_v2 = vld [vmem:[#allocation2 + $0x8] sm:$0xf]  ;;  %693 = vst.msk [vmem:[#allocation4 + $0x8] sm:$0xf] %vm692_vm11, %v688_v1  ;;  %v865_v5 = vld [vmem:[#allocation2 + $0x14] sm:$0xf] }
  0xc8   : > { %905 = vrot.lane.b32.xlu1 %v896_v2, %s2166_s25  ;;  %v863_v4 = vld [vmem:[#allocation2 + $0x8] sm:$0xf]  ;;  %v832_v7 = vld [vmem:[#allocation2 + $0x14] sm:$0xf] }
  0xc9   : > { %870 = vrot.lane.b32.xlu0 %v2264_v60, %s2167_s26  ;;  %v830_v6 = vld [vmem:[#allocation2 + $0x8] sm:$0xf]  ;;  %v799_v9 = vld [vmem:[#allocation2 + $0x14] sm:$0xf] }
  0xca   : > { %v797_v8 = vld [vmem:[#allocation2 + $0x8] sm:$0xf]  ;;  %v766_v11 = vld [vmem:[#allocation2 + $0x14] sm:$0xf] }
  0xcb   : > { %v764_v10 = vld [vmem:[#allocation2 + $0x8] sm:$0xf]  ;;  %v733_v13 = vld [vmem:[#allocation2 + $0x14] sm:$0xf] }
  0xcc   : > { %909 = vrot.lane.b32.xlu1 %v898_v3, %s2166_s25  ;;  %v731_v12 = vld [vmem:[#allocation2 + $0x8] sm:$0xf]  ;;  %v699_v15 = vld [vmem:[#allocation2 + $0x14] sm:$0xf] }
  0xcd   : > { %874 = vrot.lane.b32.xlu0 %v2262_v59, %s2167_s26  ;;  %v697_v14 = vld [vmem:[#allocation2 + $0x8] sm:$0xf]  ;;  %v931_v18 = vld [vmem:[#allocation2 + $0x14] sm:$0xf] }
  0xce   : > { %v929_v16 = vld [vmem:[#allocation2 + $0x8] sm:$0xf] }
  0xd0   : > { %872 = vrot.lane.b32.xlu1 %v863_v4, %s2167_s26 }
  0xd1   : > { %837 = vrot.lane.b32.xlu0 %v2264_v60, %s2168_s27 }
  0xd4   : > { %876 = vrot.lane.b32.xlu1 %v865_v5, %s2167_s26 }
  0xd5   : > { %841 = vrot.lane.b32.xlu0 %v2262_v59, %s2168_s27 }
  0xd8   : > { %839 = vrot.lane.b32.xlu1 %v830_v6, %s2168_s27 }
  0xd9   : > { %804 = vrot.lane.b32.xlu0 %v2264_v60, %s2169_s28 }
  0xdc   : > { %843 = vrot.lane.b32.xlu1 %v832_v7, %s2168_s27 }
  0xdd   : > { %808 = vrot.lane.b32.xlu0 %v2262_v59, %s2169_s28 }
  0xe0   : > { %806 = vrot.lane.b32.xlu1 %v797_v8, %s2169_s28 }
  0xe1   : > { %771 = vrot.lane.b32.xlu0 %v2264_v60, %s2170_s29 }
  0xe4   : > { %810 = vrot.lane.b32.xlu1 %v799_v9, %s2169_s28 }
  0xe5   : > { %775 = vrot.lane.b32.xlu0 %v2262_v59, %s2170_s29 }
  0xe8   : > { %773 = vrot.lane.b32.xlu1 %v764_v10, %s2170_s29 }
  0xe9   : > { %738 = vrot.lane.b32.xlu0 %v2264_v60, %s2171_s30 }
  0xec   : > { %777 = vrot.lane.b32.xlu1 %v766_v11, %s2170_s29 }
  0xed   : > { %742 = vrot.lane.b32.xlu0 %v2262_v59, %s2171_s30 }
  0xf0   : > { %740 = vrot.lane.b32.xlu1 %v731_v12, %s2171_s30 }
  0xf1   : > { %704 = vrot.lane.b32.xlu0 %v2264_v60, %s2172_s7 }
  0xf4   : > { %744 = vrot.lane.b32.xlu1 %v733_v13, %s2171_s30 }
  0xf5   : > { %708 = vrot.lane.b32.xlu0 %v2262_v59, %s2172_s7 }
  0xf8   : > { %706 = vrot.lane.b32.xlu1 %v697_v14, %s2172_s7 }
  0xf9   : > { %936 = vrot.lane.b32.xlu0 %v2264_v60, %s2173_s9 }
  0xfc   : > { %710 = vrot.lane.b32.xlu1 %v699_v15, %s2172_s7 }
  0xfd   : > { %940 = vrot.lane.b32.xlu0 %v2262_v59, %s2173_s9 }
 0x100   : > { %938 = vrot.lane.b32.xlu1 %v929_v16, %s2173_s9 }
 0x101   : > { %1003 = vperm.xlu0 %2115, %v999_v19  }
 0x104   : > { %942 = vrot.lane.b32.xlu1 %v931_v18, %s2173_s9 }
 0x108   : > { %1008 = vperm.xlu1 %2116, %v1000_v20  }
 0x133   : > { %v904_v21 = vpop.permute.xlu0 %903 }
 0x134   : > { %v911_v26 = vrot.slane %v904_v21, 4 }
 0x137   : > { %v908_v22 = vpop.permute.xlu0 %907 }
 0x138   : > { %v913_v28 = vrot.slane %v908_v22, 4 }
 0x13a   : > { %v906_v23 = vpop.permute.xlu1 %905 }
 0x13b   : > { %v912_v24 = vrot.slane %v906_v23, 4  ;;  %925 = vst.msk [vmem:[#allocation4 + $0xb0] sm:$0xf] %vm692_vm11, %v906_v23  ;;  %v871_v25 = vpop.permute.xlu0 %870 }
 0x13c   : > { %v878_v40 = vrot.slane %v871_v25, 4 }
 0x13d   : > { %v915_v29 = vsel %vm716_vm13, %v911_v26, %v912_v24 }
 0x13e   : > { %v910_v27 = vpop.permute.xlu1 %909  ;;  %v917_v33 = vsel %vm916_vm14, %v904_v21, %v915_v29 }
 0x13f   : > { %v914_v30 = vrot.slane %v910_v27, 4  ;;  %927 = vst.msk [vmem:[#allocation4 + $0xbc] sm:$0xf] %vm692_vm11, %v910_v27  ;;  %v875_v31 = vpop.permute.xlu0 %874 }
 0x140   : > { %v880_v43 = vrot.slane %v875_v31, 4 }
 0x141   : > { %v918_v32 = vsel %vm716_vm13, %v913_v28, %v914_v30 }
 0x142   : > { %v919_v34 = vsel %vm916_vm14, %v908_v22, %v918_v32  ;;  %v873_v35 = vpop.permute.xlu1 %872 }
 0x143   : > { %v879_v36 = vrot.slane %v873_v35, 4  ;;  %892 = vst.msk [vmem:[#allocation4 + $0x98] sm:$0xf] %vm692_vm11, %v873_v35  ;;  %v838_v37 = vpop.permute.xlu0 %837  ;;  %v2025_v38 = vcombine.high %v917_v33, %v919_v34  ;;  %v2024_v39 = vcombine.low %v917_v33, %v919_v34 }
 0x144   : > { %v845_v55 = vrot.slane %v838_v37, 4 }
 0x145   : > { %1168 = vmatprep.subr.bf16.mxu0 %v2025_v38  ;;  %v882_v44 = vsel %vm716_vm13, %v878_v40, %v879_v36 }
 0x146   : > { %v877_v41 = vpop.permute.xlu1 %876  ;;  %v2117_v42 = vld [vmem:[#allocation4 + $0xb0] ss:$12 sps:$4 sm:$0xff]   ;;  %1169 = vmatpush1.bf16.msra.mxu0 %v2024_v39  ;;  %v884_v48 = vsel %vm883_vm15, %v871_v25, %v882_v44 }
 0x147   : > { %v881_v45 = vrot.slane %v877_v41, 4  ;;  %894 = vst.msk [vmem:[#allocation4 + $0xa4] sm:$0xf] %vm692_vm11, %v877_v41  ;;  %v842_v46 = vpop.permute.xlu0 %841  ;;  %1212 = vmatpush1.bf16.msra.mxu1 %v2117_v42 }
 0x148   : > { %1213 = vmatprep.subr.bf16.mxu1 %v2149_v0  ;;  %v847_v58 = vrot.slane %v842_v46, 4 }
 0x149   : > { %v885_v47 = vsel %vm716_vm13, %v880_v43, %v881_v45 }
 0x14a   : > { %v886_v49 = vsel %vm883_vm15, %v875_v31, %v885_v47  ;;  %v840_v50 = vpop.permute.xlu1 %839 }
 0x14b   : > { %v846_v51 = vrot.slane %v840_v50, 4  ;;  %859 = vst.msk [vmem:[#allocation4 + $0x80] sm:$0xf] %vm692_vm11, %v840_v50  ;;  %v805_v52 = vpop.permute.xlu0 %804  ;;  %v2022_v53 = vcombine.high %v884_v48, %v886_v49  ;;  %v2021_v54 = vcombine.low %v884_v48, %v886_v49 }
 0x14c   : > { %v812_v11 = vrot.slane %v805_v52, 4 }
 0x14d   : > { %1170 = vmatprep.subr.bf16.mxu0 %v2022_v53  ;;  %v849_v63 = vsel %vm716_vm13, %v845_v55, %v846_v51 }
 0x14e   : > { %v844_v56 = vpop.permute.xlu1 %843  ;;  %v2118_v57 = vld [vmem:[#allocation4 + $0x98] ss:$12 sps:$4 sm:$0xff]   ;;  %1171 = vmatpush1.bf16.msra.mxu0 %v2021_v54  ;;  %v851_v4 = vsel %vm850_vm0, %v838_v37, %v849_v63 }
 0x14f   : > { %v848_v1 = vrot.slane %v844_v56, 4  ;;  %861 = vst.msk [vmem:[#allocation4 + $0x8c] sm:$0xf] %vm692_vm11, %v844_v56  ;;  %v809_v2 = vpop.permute.xlu0 %808  ;;  %1214 = vmatpush1.bf16.msra.mxu1 %v2118_v57 }
 0x150   : > { %1215 = vmatprep.subr.bf16.mxu1 %v2149_v0  ;;  %v814_v14 = vrot.slane %v809_v2, 4 }
 0x151   : > { %v852_v3 = vsel %vm716_vm13, %v847_v58, %v848_v1 }
 0x152   : > { %v853_v5 = vsel %vm850_vm0, %v842_v46, %v852_v3  ;;  %v807_v6 = vpop.permute.xlu1 %806 }
 0x153   : > { %v813_v7 = vrot.slane %v807_v6, 4  ;;  %826 = vst.msk [vmem:[#allocation4 + $0x68] sm:$0xf] %vm692_vm11, %v807_v6  ;;  %v772_v8 = vpop.permute.xlu0 %771  ;;  %v2019_v9 = vcombine.high %v851_v4, %v853_v5  ;;  %v2018_v10 = vcombine.low %v851_v4, %v853_v5 }
 0x154   : > { %v779_v26 = vrot.slane %v772_v8, 4 }
 0x155   : > { %1172 = vmatprep.subr.bf16.mxu0 %v2019_v9  ;;  %v816_v15 = vsel %vm716_vm13, %v812_v11, %v813_v7 }
 0x156   : > { %v811_v12 = vpop.permute.xlu1 %810  ;;  %v2119_v13 = vld [vmem:[#allocation4 + $0x80] ss:$12 sps:$4 sm:$0xff]   ;;  %1173 = vmatpush1.bf16.msra.mxu0 %v2018_v10  ;;  %v818_v19 = vsel %vm817_vm1, %v805_v52, %v816_v15 }
 0x157   : > { %v815_v16 = vrot.slane %v811_v12, 4  ;;  %828 = vst.msk [vmem:[#allocation4 + $0x74] sm:$0xf] %vm692_vm11, %v811_v12  ;;  %v776_v17 = vpop.permute.xlu0 %775  ;;  %1216 = vmatpush1.bf16.msra.mxu1 %v2119_v13 }
 0x158   : > { %1217 = vmatprep.subr.bf16.mxu1 %v2149_v0  ;;  %v781_v29 = vrot.slane %v776_v17, 4 }
 0x159   : > { %v819_v18 = vsel %vm716_vm13, %v814_v14, %v815_v16 }
 0x15a   : > { %v820_v20 = vsel %vm817_vm1, %v809_v2, %v819_v18  ;;  %v774_v21 = vpop.permute.xlu1 %773 }
 0x15b   : > { %v780_v22 = vrot.slane %v774_v21, 4  ;;  %793 = vst.msk [vmem:[#allocation4 + $0x50] sm:$0xf] %vm692_vm11, %v774_v21  ;;  %v739_v23 = vpop.permute.xlu0 %738  ;;  %v2016_v24 = vcombine.high %v818_v19, %v820_v20  ;;  %v2015_v25 = vcombine.low %v818_v19, %v820_v20  ;;  %v2124_v20 = vld [vmem:[#allocation4 + $0x8] ss:$12 sps:$4 sm:$0xff]  }
 0x15c   : > { %v746_v41 = vrot.slane %v739_v23, 4 }
 0x15d   : > { %1174 = vmatprep.subr.bf16.mxu0 %v2016_v24  ;;  %v783_v30 = vsel %vm716_vm13, %v779_v26, %v780_v22  ;;  %v273_v24 = vlaneseq }
 0x15e   : > { %v778_v27 = vpop.permute.xlu1 %777  ;;  %v2120_v28 = vld [vmem:[#allocation4 + $0x68] ss:$12 sps:$4 sm:$0xff]   ;;  %1175 = vmatpush1.bf16.msra.mxu0 %v2015_v25  ;;  %v785_v34 = vsel %vm2640_vm2, %v772_v8, %v783_v30 }
 0x15f   : > { %v782_v31 = vrot.slane %v778_v27, 4  ;;  %795 = vst.msk [vmem:[#allocation4 + $0x5c] sm:$0xf] %vm692_vm11, %v778_v27  ;;  %v743_v32 = vpop.permute.xlu0 %742  ;;  %1218 = vmatpush1.bf16.msra.mxu1 %v2120_v28  ;;  %v274_v59 = vand.u32 127, %v273_v24 }
 0x160   : > { %1219 = vmatprep.subr.bf16.mxu1 %v2149_v0  ;;  %v748_v44 = vrot.slane %v743_v32, 4 }
 0x161   : > { %v786_v33 = vsel %vm716_vm13, %v781_v29, %v782_v31  ;;  %v275_v60 = vadd.s32 128, %v274_v59  ;;  %v2397_v25 = vmul.u32.u64.low 3817748708, %v274_v59  ;;  %v2398_v26 = vmul.u32.u64.high 3817748708, %v274_v59, %v2397_v25 }
 0x162   : > { %v787_v35 = vsel %vm2640_vm2, %v776_v17, %v786_v33  ;;  %v741_v36 = vpop.permute.xlu1 %740 }
 0x163   : > { %v747_v37 = vrot.slane %v741_v36, 4  ;;  %760 = vst.msk [vmem:[#allocation4 + $0x38] sm:$0xf] %vm692_vm11, %v741_v36  ;;  %v705_v38 = vpop.permute.xlu0 %704  ;;  %v2013_v39 = vcombine.high %v785_v34, %v787_v35  ;;  %v2012_v40 = vcombine.low %v785_v34, %v787_v35  ;;  %v283_v31 = vshrl.u32 %v2398_v26, 4 }
 0x164   : > { %v712_v55 = vrot.slane %v705_v38, 4  ;;  %v2400_v27 = vmul.u32.u64.low 3817748708, %v275_v60  ;;  %v2401_v28 = vmul.u32.u64.high 3817748708, %v275_v60, %v2400_v27 }
 0x165   : > { %1176 = vmatprep.subr.bf16.mxu0 %v2013_v39  ;;  %v750_v45 = vsel %vm716_vm13, %v746_v41, %v747_v37  ;;  %v284_v34 = vmul.u32 18, %v283_v31 }
 0x166   : > { %v745_v42 = vpop.permute.xlu1 %744  ;;  %v2121_v43 = vld [vmem:[#allocation4 + $0x50] ss:$12 sps:$4 sm:$0xff]   ;;  %1177 = vmatpush1.bf16.msra.mxu0 %v2012_v40  ;;  %v752_v49 = vsel %vm2639_vm3, %v739_v23, %v750_v45 }
 0x167   : > { %v749_v46 = vrot.slane %v745_v42, 4  ;;  %762 = vst.msk [vmem:[#allocation4 + $0x44] sm:$0xf] %vm692_vm11, %v745_v42  ;;  %v709_v47 = vpop.permute.xlu0 %708  ;;  %1220 = vmatpush1.bf16.msra.mxu1 %v2121_v43  ;;  %v285_v37 = vsub.s32 %v274_v59, %v284_v34 }
 0x168   : > { %1221 = vmatprep.subr.bf16.mxu1 %v2149_v0  ;;  %v714_v63 = vrot.slane %v709_v47, 4 }
 0x169   : > { %v753_v48 = vsel %vm716_vm13, %v748_v44, %v749_v46  ;;  %vm310_vm6 = vcmp.ne.s32.totalorder %v285_v37, 0  ;;  %vm313_vm7 = vcmp.lt.s32.totalorder %v285_v37, 0  ;;  %v319_v41 = vadd.s32 18, %v285_v37 }
 0x16a   : > { %v754_v50 = vsel %vm2639_vm3, %v743_v32, %v753_v48  ;;  %v707_v51 = vpop.permute.xlu1 %706  ;;  %v294_v32 = vshrl.u32 %v2401_v28, 4 }
 0x16b   : > { %v713_v52 = vrot.slane %v707_v51, 4  ;;  %727 = vst.msk [vmem:[#allocation4 + $0x20] sm:$0xf] %vm692_vm11, %v707_v51  ;;  %v2010_v53 = vcombine.high %v752_v49, %v754_v50  ;;  %v2009_v54 = vcombine.low %v752_v49, %v754_v50  ;;  %v937_v56 = vpop.permute.xlu0 %936 }
 0x16c   : > { %v944_v11 = vrot.slane %v937_v56, 4  ;;  %v295_v35 = vmul.u32 18, %v294_v32 }
 0x16d   : > { %1178 = vmatprep.subr.bf16.mxu0 %v2010_v53  ;;  %v717_v1 = vsel %vm716_vm13, %v712_v55, %v713_v52 }
 0x16e   : > { %v711_v57 = vpop.permute.xlu1 %710  ;;  %v2122_v58 = vld [vmem:[#allocation4 + $0x38] ss:$12 sps:$4 sm:$0xff]   ;;  %1179 = vmatpush1.bf16.msra.mxu0 %v2009_v54  ;;  %v719_v4 = vsel %vm2638_vm4, %v705_v38, %v717_v1  ;;  %v296_v38 = vsub.s32 %v275_v60, %v295_v35  ;;  %v1631_v1 = vld [vmem:[%s2635_s5] sm:$0xff] }
 0x16f   : > { %v715_v2 = vrot.slane %v711_v57, 4  ;;  %729 = vst.msk [vmem:[#allocation4 + $0x2c] sm:$0xf] %vm692_vm11, %v711_v57  ;;  %1222 = vmatpush1.bf16.msra.mxu1 %v2122_v58  ;;  %v941_v10 = vpop.permute.xlu0 %940 }
 0x170   : > { %1223 = vmatprep.subr.bf16.mxu1 %v2149_v0  ;;  %v946_v14 = vrot.slane %v941_v10, 4  ;;  %vm311_vm8 = vcmp.ne.s32.totalorder %v296_v38, 0  ;;  %vm314_vm9 = vcmp.lt.s32.totalorder %v296_v38, 0  ;;  %v320_v42 = vadd.s32 18, %v296_v38 }
 0x171   : > { %v720_v3 = vsel %vm716_vm13, %v714_v63, %v715_v2  ;;  %vm2413_vm3 = vmand %vm314_vm9, %vm311_vm8  ;;  %v1632_v2 = vld [vmem:[%s2635_s5 + $0x8] sm:$0xff] }
 0x172   : > { %v721_v5 = vsel %vm2638_vm4, %v709_v47, %v720_v3  ;;  %v939_v6 = vpop.permute.xlu1 %938  ;;  %vm2409_vm4 = vmand %vm313_vm7, %vm310_vm6  ;;  %v323_v51 = vsel %vm2413_vm3, %v320_v42, %v296_v38 }
 0x173   : > { %v945_v7 = vrot.slane %v939_v6, 4  ;;  %958 = vst.msk [vmem:[#allocation4 + $0xc8] sm:$0xf] %vm692_vm11, %v939_v6  ;;  %v2007_v8 = vcombine.high %v719_v4, %v721_v5  ;;  %v2006_v9 = vcombine.low %v719_v4, %v721_v5  ;;  %v322_v50 = vsel %vm2409_vm4, %v319_v41, %v285_v37 }
 0x174   : > { %vm2431_vm7 = vcmp.lt.s32.totalorder %v323_v51, 16 }
 0x175   : > { %1180 = vmatprep.subr.bf16.mxu0 %v2007_v8  ;;  %v948_v15 = vsel %vm716_vm13, %v944_v11, %v945_v7 }
 0x176   : > { %v943_v12 = vpop.permute.xlu1 %942  ;;  %v2123_v13 = vld [vmem:[#allocation4 + $0x20] ss:$12 sps:$4 sm:$0xff]   ;;  %1181 = vmatpush1.bf16.msra.mxu0 %v2006_v9  ;;  %v950_v18 = vsel %vm2637_vm5, %v937_v56, %v948_v15 }
 0x177   : > { %v947_v16 = vrot.slane %v943_v12, 4  ;;  %960 = vst.msk [vmem:[#allocation4 + $0xd4] sm:$0xf] %vm692_vm11, %v943_v12  ;;  %1182 = vmatprep.subr.bf16.mxu0 %v2004_v61  ;;  %1224 = vmatpush1.bf16.msra.mxu1 %v2123_v13  ;;  %v2126_v61 = vld [vmem:[%s2632_s2] ss:$8 sps:$4 sm:$0xff]  }
 0x178   : > { %1225 = vmatprep.subr.bf16.mxu1 %v2149_v0 }
 0x179   : > { %v951_v17 = vsel %vm716_vm13, %v946_v14, %v947_v16 }
 0x17a   : > { %v952_v19 = vsel %vm2637_vm5, %v941_v10, %v951_v17  ;;  %1183 = vmatpush1.bf16.msra.mxu0 %v2003_v62  ;;  %v276_v62 = vadd.s32 256, %v274_v59 }
 0x17b   : > { %v2028_v21 = vcombine.high %v950_v18, %v952_v19  ;;  %v2027_v22 = vcombine.low %v950_v18, %v952_v19  ;;  %1226 = vmatpush1.bf16.msra.mxu1 %v2124_v20 }
 0x17c   : > { %1241 = vmatprep.subr.bf16.mxu1 %v2149_v0  ;;  %v2403_v29 = vmul.u32.u64.low 3817748708, %v276_v62  ;;  %v2404_v30 = vmul.u32.u64.high 3817748708, %v276_v62, %v2403_v29  ;;  %v1004_v43 = vpop.permute.xlu0 %1003 }
 0x17d   : > { %1198 = vmatprep.subr.bf16.mxu0 %v2028_v21 }
 0x17e   : > { %v2125_v23 = vld [vmem:[#allocation4 + $0xc8] ss:$12 sps:$4 sm:$0xff]   ;;  %1199 = vmatpush2.bf16.msra.mxu0 %v2027_v22  ;;  %v305_v33 = vshrl.u32 %v2404_v30, 4 }
 0x17f   : > { %1242 = vmatpush2.bf16.msra.mxu1 %v2125_v23 }
 0x180   : > { %1842 = vmatprep.subr.bf16.mxu1 %v2149_v0  ;;  %v306_v36 = vmul.u32 18, %v305_v33 }
 0x181   : > { %1201 = vmatmul.mubr.bf16.vlgmr.msra.gmra.mxu0 %v2126_v61 }
 0x182   : > { %1244 = vmatmul.mubr.bf16.vlgmr.msra.gmra.mxu1 %v2126_v61  ;;  %v307_v39 = vsub.s32 %v276_v62, %v306_v36 }
 0x183   : > { %v1009_v49 = vpop.permute.xlu1 %1008 }
 0x184   : > { %vm312_vm10 = vcmp.ne.s32.totalorder %v307_v39, 0  ;;  %vm315_vm5 = vcmp.lt.s32.totalorder %v307_v39, 0  ;;  %v321_v45 = vadd.s32 18, %v307_v39 }
 0x185   : > { %vm2417_vm2 = vmand %vm315_vm5, %vm312_vm10  ;;  %vm2427_vm5 = vcmp.lt.s32.totalorder %v322_v50, 16 }
 0x186   : > { %v324_v54 = vsel %vm2417_vm2, %v321_v45, %v307_v39 }
 0x187   : > { %vm2435_vm2 = vcmp.lt.s32.totalorder %v324_v54, 16 }
 0x241   : > { %v1202_v47 = vpop.f32.mrf.mxu0 }
 0x242   : > { %v1203_v48 = vadd.f32 %v1202_v47, %v1004_v43  ;;  %v1245_v52 = vpop.f32.mrf.mxu1 }
 0x243   : > { %v1204_v53 = vpop.f32.mrf.mxu0  ;;  %v1246_v55 = vadd.f32 %v1245_v52, %v1004_v43 }
 0x244   : > { %vm1252_vm6 = vcmp.ge.f32.partialorder %v1203_v48, 0.0  ;;  %v1258_v56 = vmul.f32 0.01, %v1203_v48  ;;  %v1205_v57 = vadd.f32 %v1204_v53, %v1004_v43  ;;  %v1247_v58 = vpop.f32.mrf.mxu1 }
 0x245   : > { %v1206_v63 = vpop.f32.mrf.mxu0  ;;  %v1260_v3 = vmul.f32 0.01, %v1246_v55  ;;  %vm1254_vm4 = vcmp.ge.f32.partialorder %v1246_v55, 0.0  ;;  %v2138_v58 = vld [vmem:[%s2633_s3 + $0x4] ss:$8 sps:$4 sm:$0xff]  }
 0x246   : > { %vm1253_vm3 = vcmp.ge.f32.partialorder %v1205_v57, 0.0  ;;  %v1259_v4 = vmul.f32 0.01, %v1205_v57  ;;  %v1207_v5 = vadd.f32 %v1206_v63, %v1009_v49  ;;  %v1248_v6 = vpop.f32.mrf.mxu1  ;;  %v1264_v8 = vsel %vm1252_vm6, %v1203_v48, %v1258_v56  ;;  %2066 = vmatprep.mubr.msk.bf16.mxu1 %vm1164_vm12, %v2138_v58  ;;  %2065 = vmatprep.mubr.msk.bf16.mxu0 %vm1164_vm12, %v2138_v58 }
 0x247   : > { %v1208_v7 = vpop.f32.mrf.mxu0  ;;  %v1249_v12 = vadd.f32 %v1248_v6, %v1009_v49  ;;  %v1280_v15 = vsel %vm2427_vm5, %v1264_v8, 0.0  ;;  %v1266_v17 = vsel %vm1254_vm4, %v1246_v55, %v1260_v3  ;;  %vm1321_vm6 = vcmask 1043608  }
 0x248   : > { %v1265_v10 = vsel %vm1253_vm3, %v1205_v57, %v1259_v4  ;;  %vm1255_vm8 = vcmp.ge.f32.partialorder %v1207_v5, 0.0  ;;  %v1261_v11 = vmul.f32 0.01, %v1207_v5  ;;  %v1209_v13 = vadd.f32 %v1208_v7, %v1009_v49  ;;  %v1250_v14 = vpop.f32.mrf.mxu1 }
 0x249   : > { %v1281_v16 = vsel %vm2431_vm7, %v1265_v10, 0.0  ;;  %vm1257_vm9 = vcmp.ge.f32.partialorder %v1249_v12, 0.0  ;;  %v1263_v18 = vmul.f32 0.01, %v1249_v12  ;;  %v1282_v22 = vsel %vm2435_vm2, %v1266_v17, 0.0 }
 0x24a   : > { %v2071_v19 = vpack.c.bf16 %v1281_v16, %v1280_v15  ;;  %v1267_v20 = vsel %vm1255_vm8, %v1207_v5, %v1261_v11  ;;  %vm1256_vm10 = vcmp.ge.f32.partialorder %v1209_v13, 0.0  ;;  %v1262_v21 = vmul.f32 0.01, %v1209_v13 }
 0x24b   : > { %v1269_v61 = vsel %vm1257_vm9, %v1249_v12, %v1263_v18  ;;  %v1283_v24 = vsel %vm2427_vm5, %v1267_v20, 0.0  ;;  %v2072_v60 = vpack.c.bf16 %v1282_v22, %v1282_v22  ;;  %vm1322_vm3 = vcmask 1047556  }
 0x24c   : > { %1302 = vrot.lane.b32.xlu1 %v2071_v19, %s2151_s8  ;;  %v1268_v23 = vsel %vm1256_vm10, %v1209_v13, %v1262_v21  ;;  %v1285_v25 = vsel %vm2435_vm2, %v1269_v61, 0.0  ;;  %vm1312_vm4 = vcmask 154624   ;;  %vm1323_vm5 = vmor %vm1322_vm3, %vm1321_vm6  ;;  %vm2653_vm12 = vcmask 900096  }
 0x24d   : > { %v1284_v59 = vsel %vm2431_vm7, %v1268_v23, 0.0  ;;  %v2074_v26 = vpack.c.bf16 %v1285_v25, %v1285_v25  ;;  %vm1325_vm7 = vcmask 412672   ;;  %vm2654_vm2 = vcmask 1031168  }
 0x24e   : > { %v2073_v62 = vpack.c.bf16 %v1284_v59, %v1283_v24  ;;  %vm2655_vm8 = vcmask 1039360  }
 0x250   : > { %1304 = vrot.lane.b32.xlu1 %v2072_v60, %s2151_s8  ;;  %1306 = vrot.lane.b32.xlu0 %v2073_v62, %s2151_s8 }
 0x254   : > { %1308 = vrot.lane.b32.xlu0 %v2074_v26, %s2151_s8 }
 0x2be   : > { %v1303_v27 = vpop.permute.xlu1 %1302 }
 0x2bf   : > { %v1310_v28 = vrot.slane %v1303_v27, 4 }
 0x2c1   : > { %v1313_v29 = vsel %vm1312_vm4, %v1310_v28, %v1303_v27 }
 0x2c2   : > { %1324 = vst.msk [vmem:[#allocation3] sm:$0xff] %vm1323_vm5, %v1313_v29  ;;  %v1305_v30 = vpop.permute.xlu1 %1304  ;;  %v1307_v32 = vpop.permute.xlu0 %1306 }
 0x2c3   : > { %v1314_v31 = vsel %vm1312_vm4, %v1310_v28, %v1305_v30  ;;  %v1311_v33 = vrot.slane %v1307_v32, 4 }
 0x2c4   : > { %1326 = vst.msk [vmem:[#allocation3 + $0x8] sm:$0xf] %vm1325_vm7, %v1314_v31 }
 0x2c5   : > { %v1315_v34 = vsel %vm1312_vm4, %v1311_v33, %v1307_v32 }
 0x2c6   : > { %1327 = vst.msk [vmem:[#allocation3 + $0xc] sm:$0xff] %vm1323_vm5, %v1315_v34  ;;  %v1309_v35 = vpop.permute.xlu0 %1308 }
 0x2c7   : > { %v1316_v36 = vsel %vm1312_vm4, %v1311_v33, %v1309_v35 }
 0x2c8   : > { %1328 = vst.msk [vmem:[#allocation3 + $0x14] sm:$0xf] %vm1325_vm7, %v1316_v36 }
 0x2c9   : > { %v2455_v37 = vld [vmem:[#allocation3] sm:$0xff] }
 0x2ca   : > { %1537 = vrot.lane.b32.xlu1 %v2455_v37, %s2166_s25 }
 0x2cb   : > { %v1330_v38 = vld [vmem:[#allocation3 + $0x8] sm:$0xf] }
 0x2cc   : > { %v1530_v39 = vld [vmem:[#allocation3 + $0x8] sm:$0xf]  ;;  %1334 = vst.msk [vmem:[#allocation4 + $0x8] sm:$0xf] %vm692_vm11, %v1330_v38 }
 0x2cd   : > { %1539 = vrot.lane.b32.xlu0 %v1530_v39, %s2166_s25  ;;  %v2461_v40 = vld [vmem:[#allocation3 + $0xc] sm:$0xff]  ;;  %v1498_v41 = vld [vmem:[#allocation3 + $0x8] sm:$0xf] }
 0x2ce   : > { %1505 = vrot.lane.b32.xlu1 %v2455_v37, %s2167_s26  ;;  %v2038_v42 = vcombine.low %v2455_v37, %v2461_v40  ;;  %v2039_v43 = vcombine.high %v2455_v37, %v2461_v40  ;;  %v1466_v45 = vld [vmem:[#allocation3 + $0x8] sm:$0xf] }
 0x2cf   : > { %v1332_v44 = vld [vmem:[#allocation3 + $0x14] sm:$0xf]  ;;  %v1434_v46 = vld [vmem:[#allocation3 + $0x8] sm:$0xf] }
 0x2d0   : > { %1336 = vst.msk [vmem:[#allocation4 + $0x14] sm:$0xf] %vm692_vm11, %v1332_v44  ;;  %v1402_v47 = vld [vmem:[#allocation3 + $0x8] sm:$0xf]  ;;  %v1532_v50 = vld [vmem:[#allocation3 + $0x14] sm:$0xf] }
 0x2d1   : > { %1507 = vrot.lane.b32.xlu0 %v1498_v41, %s2167_s26  ;;  %v1370_v48 = vld [vmem:[#allocation3 + $0x8] sm:$0xf]  ;;  %v1500_v51 = vld [vmem:[#allocation3 + $0x14] sm:$0xf] }
 0x2d2   : > { %1473 = vrot.lane.b32.xlu1 %v2455_v37, %s2168_s27  ;;  %v1338_v49 = vld [vmem:[#allocation3 + $0x8] sm:$0xf]  ;;  %v1468_v52 = vld [vmem:[#allocation3 + $0x14] sm:$0xf] }
 0x2d3   : > { %v1436_v53 = vld [vmem:[#allocation3 + $0x14] sm:$0xf]  ;;  %v1562_v57 = vld [vmem:[#allocation3 + $0x8] sm:$0xf] }
 0x2d4   : > { %v1404_v54 = vld [vmem:[#allocation3 + $0x14] sm:$0xf] }
 0x2d5   : > { %1475 = vrot.lane.b32.xlu0 %v1466_v45, %s2168_s27  ;;  %v1372_v55 = vld [vmem:[#allocation3 + $0x14] sm:$0xf] }
 0x2d6   : > { %1441 = vrot.lane.b32.xlu1 %v2455_v37, %s2169_s28  ;;  %v1340_v56 = vld [vmem:[#allocation3 + $0x14] sm:$0xf] }
 0x2d7   : > { %v1564_v63 = vld [vmem:[#allocation3 + $0x14] sm:$0xf] }
 0x2d9   : > { %1443 = vrot.lane.b32.xlu0 %v1434_v46, %s2169_s28 }
 0x2da   : > { %1409 = vrot.lane.b32.xlu1 %v2455_v37, %s2170_s29 }
 0x2dd   : > { %1411 = vrot.lane.b32.xlu0 %v1402_v47, %s2170_s29 }
 0x2de   : > { %1377 = vrot.lane.b32.xlu1 %v2455_v37, %s2171_s30 }
 0x2e1   : > { %1379 = vrot.lane.b32.xlu0 %v1370_v48, %s2171_s30 }
 0x2e2   : > { %1345 = vrot.lane.b32.xlu1 %v2455_v37, %s2172_s7 }
 0x2e5   : > { %1347 = vrot.lane.b32.xlu0 %v1338_v49, %s2172_s7 }
 0x2e6   : > { %1541 = vrot.lane.b32.xlu1 %v2461_v40, %s2166_s25 }
 0x2e9   : > { %1543 = vrot.lane.b32.xlu0 %v1532_v50, %s2166_s25 }
 0x2ea   : > { %1509 = vrot.lane.b32.xlu1 %v2461_v40, %s2167_s26 }
 0x2ed   : > { %1511 = vrot.lane.b32.xlu0 %v1500_v51, %s2167_s26 }
 0x2ee   : > { %1477 = vrot.lane.b32.xlu1 %v2461_v40, %s2168_s27 }
 0x2f1   : > { %1479 = vrot.lane.b32.xlu0 %v1468_v52, %s2168_s27  ;;  %s2075_s27 = smul.u32 48, %s2662_s22 }
 0x2f2   : > { %1445 = vrot.lane.b32.xlu1 %v2461_v40, %s2169_s28 }
 0x2f5   : > { %1447 = vrot.lane.b32.xlu0 %v1436_v53, %s2169_s28 }
 0x2f6   : > { %1413 = vrot.lane.b32.xlu1 %v2461_v40, %s2170_s29 }
 0x2f9   : > { %1415 = vrot.lane.b32.xlu0 %v1404_v54, %s2170_s29 }
 0x2fa   : > { %1381 = vrot.lane.b32.xlu1 %v2461_v40, %s2171_s30 }
 0x2fd   : > { %1383 = vrot.lane.b32.xlu0 %v1372_v55, %s2171_s30  ;;  %s2617_s30 = scalar_lea.vmem %s2636_s6, %s2075_s27 }
 0x2fe   : > { %1349 = vrot.lane.b32.xlu1 %v2461_v40, %s2172_s7 }
 0x301   : > { %1351 = vrot.lane.b32.xlu0 %v1340_v56, %s2172_s7 }
 0x302   : > { %1569 = vrot.lane.b32.xlu1 %v2455_v37, %s2173_s9 }
 0x305   : > { %1571 = vrot.lane.b32.xlu0 %v1562_v57, %s2173_s9 }
 0x306   : > { %1573 = vrot.lane.b32.xlu1 %v2461_v40, %s2173_s9 }
 0x309   : > { %1575 = vrot.lane.b32.xlu0 %v1564_v63, %s2173_s9 }
 0x30a   : > { %1635 = vperm.xlu1 %2116, %v1631_v1  }
 0x30d   : > { %1640 = vperm.xlu0 %2115, %v1632_v2  }
 0x33c   : > { %v1538_v3 = vpop.permute.xlu1 %1537 }
 0x33d   : > { %v1545_v5 = vrot.slane %v1538_v3, 4 }
 0x33f   : > { %v1540_v4 = vpop.permute.xlu0 %1539 }
 0x340   : > { %v1546_v6 = vrot.slane %v1540_v4, 4  ;;  %1558 = vst.msk [vmem:[#allocation4 + $0xb0] sm:$0xf] %vm692_vm11, %v1540_v4  ;;  %v1506_v7 = vpop.permute.xlu1 %1505 }
 0x341   : > { %v1513_v11 = vrot.slane %v1506_v7, 4 }
 0x342   : > { %v1549_v8 = vsel %vm716_vm13, %v1545_v5, %v1546_v6 }
 0x343   : > { %v1550_v9 = vsel %vm916_vm14, %v1538_v3, %v1549_v8  ;;  %v1508_v10 = vpop.permute.xlu0 %1507 }
 0x344   : > { %v1514_v12 = vrot.slane %v1508_v10, 4  ;;  %1526 = vst.msk [vmem:[#allocation4 + $0x98] sm:$0xf] %vm692_vm11, %v1508_v10  ;;  %v1474_v13 = vpop.permute.xlu1 %1473 }
 0x345   : > { %v1481_v17 = vrot.slane %v1474_v13, 4 }
 0x346   : > { %v1517_v14 = vsel %vm716_vm13, %v1513_v11, %v1514_v12 }
 0x347   : > { %v2530_v15 = vsel %vm883_vm15, %v1506_v7, %v1517_v14  ;;  %v1476_v16 = vpop.permute.xlu0 %1475 }
 0x348   : > { %v1482_v18 = vrot.slane %v1476_v16, 4  ;;  %1494 = vst.msk [vmem:[#allocation4 + $0x80] sm:$0xf] %vm692_vm11, %v1476_v16  ;;  %v1442_v19 = vpop.permute.xlu1 %1441 }
 0x349   : > { %v1449_v61 = vrot.slane %v1442_v19, 4 }
 0x34a   : > { %v1485_v20 = vsel %vm716_vm13, %v1481_v17, %v1482_v18 }
 0x34b   : > { %v2535_v21 = vsel %vm850_vm0, %v1474_v13, %v1485_v20  ;;  %v1444_v22 = vpop.permute.xlu0 %1443 }
 0x34c   : > { %v1450_v23 = vrot.slane %v1444_v22, 4  ;;  %1462 = vst.msk [vmem:[#allocation4 + $0x68] sm:$0xf] %vm692_vm11, %v1444_v22  ;;  %v1410_v24 = vpop.permute.xlu1 %1409 }
 0x34d   : > { %v1417_v25 = vrot.slane %v1410_v24, 4 }
 0x34e   : > { %v1453_v59 = vsel %vm716_vm13, %v1449_v61, %v1450_v23 }
 0x34f   : > { %v2540_v60 = vsel %vm817_vm1, %v1442_v19, %v1453_v59  ;;  %v1412_v62 = vpop.permute.xlu0 %1411 }
 0x350   : > { %v1418_v26 = vrot.slane %v1412_v62, 4  ;;  %1430 = vst.msk [vmem:[#allocation4 + $0x50] sm:$0xf] %vm692_vm11, %v1412_v62  ;;  %v1378_v27 = vpop.permute.xlu1 %1377 }
 0x351   : > { %v1385_v31 = vrot.slane %v1378_v27, 4 }
 0x352   : > { %v1421_v28 = vsel %vm716_vm13, %v1417_v25, %v1418_v26 }
 0x353   : > { %v2545_v29 = vsel %vm2653_vm12, %v1410_v24, %v1421_v28  ;;  %v1380_v30 = vpop.permute.xlu0 %1379 }
 0x354   : > { %v1386_v32 = vrot.slane %v1380_v30, 4  ;;  %1398 = vst.msk [vmem:[#allocation4 + $0x38] sm:$0xf] %vm692_vm11, %v1380_v30  ;;  %v1346_v33 = vpop.permute.xlu1 %1345 }
 0x355   : > { %v1353_v38 = vrot.slane %v1346_v33, 4 }
 0x356   : > { %v1389_v34 = vsel %vm716_vm13, %v1385_v31, %v1386_v32 }
 0x357   : > { %v2550_v35 = vsel %vm2654_vm2, %v1378_v27, %v1389_v34  ;;  %v1348_v36 = vpop.permute.xlu0 %1347 }
 0x358   : > { %v1354_v39 = vrot.slane %v1348_v36, 4  ;;  %1366 = vst.msk [vmem:[#allocation4 + $0x20] sm:$0xf] %vm692_vm11, %v1348_v36  ;;  %v1542_v41 = vpop.permute.xlu1 %1541 }
 0x359   : > { %v1547_v47 = vrot.slane %v1542_v41, 4 }
 0x35a   : > { %v1357_v44 = vsel %vm716_vm13, %v1353_v38, %v1354_v39 }
 0x35b   : > { %v2555_v45 = vsel %vm2655_vm8, %v1346_v33, %v1357_v44  ;;  %v1544_v46 = vpop.permute.xlu0 %1543 }
 0x35c   : > { %v1548_v48 = vrot.slane %v1544_v46, 4  ;;  %1560 = vst.msk [vmem:[#allocation4 + $0xbc] sm:$0xf] %vm692_vm11, %v1544_v46  ;;  %v1510_v49 = vpop.permute.xlu1 %1509 }
 0x35d   : > { %v1515_v53 = vrot.slane %v1510_v49, 4 }
 0x35e   : > { %v1551_v50 = vsel %vm716_vm13, %v1547_v47, %v1548_v48 }
 0x35f   : > { %v1552_v51 = vsel %vm916_vm14, %v1542_v41, %v1551_v50  ;;  %v1512_v52 = vpop.permute.xlu0 %1511  ;;  %vm2656_vm14 = vmmov %vm2653_vm12 }
 0x360   : > { %v1516_v54 = vrot.slane %v1512_v52, 4  ;;  %1528 = vst.msk [vmem:[#allocation4 + $0xa4] sm:$0xf] %vm692_vm11, %v1512_v52  ;;  %v2059_v55 = vcombine.low %v1550_v9, %v1552_v51  ;;  %v2060_v56 = vcombine.high %v1550_v9, %v1552_v51  ;;  %v1478_v57 = vpop.permute.xlu1 %1477 }
 0x361   : > { %v1483_v3 = vrot.slane %v1478_v57, 4 }
 0x362   : > { %v1519_v58 = vsel %vm716_vm13, %v1515_v53, %v1516_v54  ;;  %1799 = vmatprep.subr.bf16.mxu0 %v2060_v56 }
 0x363   : > { %v1520_v63 = vsel %vm883_vm15, %v1510_v49, %v1519_v58  ;;  %v1480_v1 = vpop.permute.xlu0 %1479  ;;  %v2129_v2 = vld [vmem:[#allocation4 + $0xb0] ss:$12 sps:$4 sm:$0xff]   ;;  %1800 = vmatpush1.bf16.msra.mxu0 %v2059_v55  ;;  %vm2657_vm15 = vmmov %vm2654_vm2 }
 0x364   : > { %v1484_v4 = vrot.slane %v1480_v1, 4  ;;  %1496 = vst.msk [vmem:[#allocation4 + $0x8c] sm:$0xf] %vm692_vm11, %v1480_v1  ;;  %v2056_v5 = vcombine.low %v2530_v15, %v1520_v63  ;;  %v2057_v6 = vcombine.high %v2530_v15, %v1520_v63  ;;  %v1446_v7 = vpop.permute.xlu1 %1445  ;;  %1843 = vmatpush1.bf16.msra.mxu1 %v2129_v2  ;;  %v2136_v2 = vld [vmem:[#allocation4 + $0x8] ss:$12 sps:$4 sm:$0xff]  }
 0x365   : > { %1844 = vmatprep.subr.bf16.mxu1 %v2149_v0  ;;  %v1451_v12 = vrot.slane %v1446_v7, 4 }
 0x366   : > { %v1487_v8 = vsel %vm716_vm13, %v1483_v3, %v1484_v4  ;;  %1801 = vmatprep.subr.bf16.mxu0 %v2057_v6 }
 0x367   : > { %v1488_v9 = vsel %vm850_vm0, %v1478_v57, %v1487_v8  ;;  %v1448_v10 = vpop.permute.xlu0 %1447  ;;  %v2130_v11 = vld [vmem:[#allocation4 + $0x98] ss:$12 sps:$4 sm:$0xff]   ;;  %1802 = vmatpush1.bf16.msra.mxu0 %v2056_v5  ;;  %vm2658_vm0 = vmmov %vm2655_vm8 }
 0x368   : > { %v1452_v13 = vrot.slane %v1448_v10, 4  ;;  %1464 = vst.msk [vmem:[#allocation4 + $0x74] sm:$0xf] %vm692_vm11, %v1448_v10  ;;  %v2053_v14 = vcombine.low %v2535_v21, %v1488_v9  ;;  %v2054_v15 = vcombine.high %v2535_v21, %v1488_v9  ;;  %v1414_v16 = vpop.permute.xlu1 %1413  ;;  %1845 = vmatpush1.bf16.msra.mxu1 %v2130_v11 }
 0x369   : > { %1846 = vmatprep.subr.bf16.mxu1 %v2149_v0  ;;  %v1419_v22 = vrot.slane %v1414_v16, 4 }
 0x36a   : > { %v1455_v17 = vsel %vm716_vm13, %v1451_v12, %v1452_v13  ;;  %1803 = vmatprep.subr.bf16.mxu0 %v2054_v15 }
 0x36b   : > { %v1456_v18 = vsel %vm817_vm1, %v1446_v7, %v1455_v17  ;;  %v1416_v19 = vpop.permute.xlu0 %1415  ;;  %v2131_v20 = vld [vmem:[#allocation4 + $0x80] ss:$12 sps:$4 sm:$0xff]   ;;  %1804 = vmatpush1.bf16.msra.mxu0 %v2053_v14  ;;  %vm2659_vm1 = vcmask 736256  }
 0x36c   : > { %v1420_v61 = vrot.slane %v1416_v19, 4  ;;  %1432 = vst.msk [vmem:[#allocation4 + $0x5c] sm:$0xf] %vm692_vm11, %v1416_v19  ;;  %v2050_v23 = vcombine.low %v2540_v60, %v1456_v18  ;;  %v2051_v21 = vcombine.high %v2540_v60, %v1456_v18  ;;  %v1382_v24 = vpop.permute.xlu1 %1381  ;;  %1847 = vmatpush1.bf16.msra.mxu1 %v2131_v20  ;;  %vm2660_vm9 = vmmov %vm2659_vm1 }
 0x36d   : > { %1848 = vmatprep.subr.bf16.mxu1 %v2149_v0  ;;  %v1387_v27 = vrot.slane %v1382_v24, 4 }
 0x36e   : > { %v1423_v59 = vsel %vm716_vm13, %v1419_v22, %v1420_v61  ;;  %1805 = vmatprep.subr.bf16.mxu0 %v2051_v21 }
 0x36f   : > { %v1424_v62 = vsel %vm2656_vm14, %v1414_v16, %v1423_v59  ;;  %v1384_v25 = vpop.permute.xlu0 %1383  ;;  %v2132_v26 = vld [vmem:[#allocation4 + $0x68] ss:$12 sps:$4 sm:$0xff]   ;;  %1806 = vmatpush1.bf16.msra.mxu0 %v2050_v23 }
 0x370   : > { %v1388_v28 = vrot.slane %v1384_v25, 4  ;;  %1400 = vst.msk [vmem:[#allocation4 + $0x44] sm:$0xf] %vm692_vm11, %v1384_v25  ;;  %v2047_v30 = vcombine.low %v2545_v29, %v1424_v62  ;;  %v2048_v60 = vcombine.high %v2545_v29, %v1424_v62  ;;  %v1350_v31 = vpop.permute.xlu1 %1349  ;;  %1849 = vmatpush1.bf16.msra.mxu1 %v2132_v26 }
 0x371   : > { %1850 = vmatprep.subr.bf16.mxu1 %v2149_v0  ;;  %v1355_v38 = vrot.slane %v1350_v31, 4 }
 0x372   : > { %v1391_v32 = vsel %vm716_vm13, %v1387_v27, %v1388_v28  ;;  %1807 = vmatprep.subr.bf16.mxu0 %v2048_v60 }
 0x373   : > { %v1392_v33 = vsel %vm2657_vm15, %v1382_v24, %v1391_v32  ;;  %v1352_v34 = vpop.permute.xlu0 %1351  ;;  %v2133_v36 = vld [vmem:[#allocation4 + $0x50] ss:$12 sps:$4 sm:$0xff]   ;;  %1808 = vmatpush1.bf16.msra.mxu0 %v2047_v30 }
 0x374   : > { %v1356_v39 = vrot.slane %v1352_v34, 4  ;;  %1368 = vst.msk [vmem:[#allocation4 + $0x2c] sm:$0xf] %vm692_vm11, %v1352_v34  ;;  %v2044_v41 = vcombine.low %v2550_v35, %v1392_v33  ;;  %v2045_v29 = vcombine.high %v2550_v35, %v1392_v33  ;;  %v1570_v44 = vpop.permute.xlu1 %1569  ;;  %1851 = vmatpush1.bf16.msra.mxu1 %v2133_v36 }
 0x375   : > { %1852 = vmatprep.subr.bf16.mxu1 %v2149_v0  ;;  %v1577_v50 = vrot.slane %v1570_v44, 4 }
 0x376   : > { %v1359_v46 = vsel %vm716_vm13, %v1355_v38, %v1356_v39  ;;  %1809 = vmatprep.subr.bf16.mxu0 %v2045_v29 }
 0x377   : > { %v1360_v47 = vsel %vm2658_vm0, %v1350_v31, %v1359_v46  ;;  %v1572_v48 = vpop.permute.xlu0 %1571  ;;  %v2134_v49 = vld [vmem:[#allocation4 + $0x38] ss:$12 sps:$4 sm:$0xff]   ;;  %1810 = vmatpush1.bf16.msra.mxu0 %v2044_v41 }
 0x378   : > { %v1578_v51 = vrot.slane %v1572_v48, 4  ;;  %1590 = vst.msk [vmem:[#allocation4 + $0xc8] sm:$0xf] %vm692_vm11, %v1572_v48  ;;  %v2041_v52 = vcombine.low %v2555_v45, %v1360_v47  ;;  %v2042_v35 = vcombine.high %v2555_v45, %v1360_v47  ;;  %v1574_v53 = vpop.permute.xlu1 %1573  ;;  %1853 = vmatpush1.bf16.msra.mxu1 %v2134_v49 }
 0x379   : > { %1854 = vmatprep.subr.bf16.mxu1 %v2149_v0  ;;  %v1579_v58 = vrot.slane %v1574_v53, 4 }
 0x37a   : > { %v1581_v54 = vsel %vm716_vm13, %v1577_v50, %v1578_v51  ;;  %1811 = vmatprep.subr.bf16.mxu0 %v2042_v35 }
 0x37b   : > { %v1582_v55 = vsel %vm2659_vm1, %v1570_v44, %v1581_v54  ;;  %v1576_v56 = vpop.permute.xlu0 %1575  ;;  %v2135_v57 = vld [vmem:[#allocation4 + $0x20] ss:$12 sps:$4 sm:$0xff]   ;;  %1812 = vmatpush1.bf16.msra.mxu0 %v2041_v52 }
 0x37c   : > { %v1580_v63 = vrot.slane %v1576_v56, 4  ;;  %1592 = vst.msk [vmem:[#allocation4 + $0xd4] sm:$0xf] %vm692_vm11, %v1576_v56  ;;  %1813 = vmatprep.subr.bf16.mxu0 %v2039_v43  ;;  %1855 = vmatpush1.bf16.msra.mxu1 %v2135_v57  ;;  %v2140_v43 = vld [vmem:[%s2633_s3] ss:$8 sps:$4 sm:$0xff]  }
 0x37d   : > { %1856 = vmatprep.subr.bf16.mxu1 %v2149_v0 }
 0x37e   : > { %v1583_v45 = vsel %vm716_vm13, %v1579_v58, %v1580_v63  ;;  %vm1903_vm13 = vcmask 261120  }
 0x37f   : > { %v1584_v1 = vsel %vm2660_vm9, %v1574_v53, %v1583_v45  ;;  %1814 = vmatpush1.bf16.msra.mxu0 %v2038_v42 }
 0x380   : > { %v2062_v3 = vcombine.low %v1582_v55, %v1584_v1  ;;  %v2063_v4 = vcombine.high %v1582_v55, %v1584_v1  ;;  %1857 = vmatpush1.bf16.msra.mxu1 %v2136_v2 }
 0x381   : > { %1872 = vmatprep.subr.bf16.mxu1 %v2149_v0 }
 0x382   : > { %1829 = vmatprep.subr.bf16.mxu0 %v2063_v4 }
 0x383   : > { %v2137_v5 = vld [vmem:[#allocation4 + $0xc8] ss:$12 sps:$4 sm:$0xff]   ;;  %1830 = vmatpush2.bf16.msra.mxu0 %v2062_v3 }
 0x384   : > { %1873 = vmatpush2.bf16.msra.mxu1 %v2137_v5 }
 0x385   : > { %v1636_v6 = vpop.permute.xlu1 %1635 }
 0x386   : > { %1832 = vmatmul.mubr.bf16.vlgmr.msra.gmra.mxu0 %v2140_v43 }
 0x387   : > { %1875 = vmatmul.mubr.bf16.vlgmr.msra.gmra.mxu1 %v2140_v43 }
 0x388   : > { %v1641_v12 = vpop.permute.xlu0 %1640 }
 0x446   : > { %v1833_v7 = vpop.f32.mrf.mxu0 }
 0x447   : > { %v1834_v37 = vadd.f32 %v1833_v7, %v1636_v6  ;;  %v1876_v40 = vpop.f32.mrf.mxu1 }
 0x448   : > { %v1835_v42 = vpop.f32.mrf.mxu0  ;;  %v1877_v0 = vadd.f32 %v1876_v40, %v1636_v6 }
 0x449   : > { %vm1883_vm11 = vcmp.ge.f32.partialorder %v1834_v37, 0.0  ;;  %v1889_v8 = vmul.f32 0.01, %v1834_v37  ;;  %v1836_v9 = vadd.f32 %v1835_v42, %v1636_v6  ;;  %v1878_v10 = vpop.f32.mrf.mxu1 }
 0x44a   : > { %v1837_v11 = vpop.f32.mrf.mxu0  ;;  %vm1885_vm10 = vcmp.ge.f32.partialorder %v1877_v0, 0.0  ;;  %v1891_v13 = vmul.f32 0.01, %v1877_v0 }
 0x44b   : > { %v1895_v14 = vsel %vm1883_vm11, %v1834_v37, %v1889_v8  ;;  %vm1884_vm6 = vcmp.ge.f32.partialorder %v1836_v9, 0.0  ;;  %v1879_v15 = vpop.f32.mrf.mxu1  ;;  %v1890_v16 = vmul.f32 0.01, %v1836_v9  ;;  %v1838_v17 = vadd.f32 %v1837_v11, %v1641_v12 }
 0x44c   : > { %1901 = vst [vmem:[%s2617_s30] sm:$0xff] %v1895_v14  ;;  %v1839_v18 = vpop.f32.mrf.mxu0  ;;  %v1897_v19 = vsel %vm1885_vm10, %v1877_v0, %v1891_v13  ;;  %v1880_v20 = vadd.f32 %v1879_v15, %v1641_v12 }
 0x44d   : > { %v1840_v22 = vadd.f32 %v1839_v18, %v1641_v12  ;;  %1904 = vst.msk [vmem:[%s2617_s30 + $0x10] sm:$0xff] %vm1903_vm13, %v1897_v19  ;;  %v1896_v61 = vsel %vm1884_vm6, %v1836_v9, %v1890_v16  ;;  %v1881_v23 = vpop.f32.mrf.mxu1  ;;  %vm1886_vm3 = vcmp.ge.f32.partialorder %v1838_v17, 0.0  ;;  %v1892_v21 = vmul.f32 0.01, %v1838_v17 }
 0x44e   : > { %vm1888_vm4 = vcmp.ge.f32.partialorder %v1880_v20, 0.0  ;;  %v1894_v24 = vmul.f32 0.01, %v1880_v20  ;;  %1902 = vst [vmem:[%s2617_s30 + $0x8] sm:$0xff] %v1896_v61 }
 0x44f   : > { %vm1887_vm5 = vcmp.ge.f32.partialorder %v1840_v22, 0.0  ;;  %v1893_v59 = vmul.f32 0.01, %v1840_v22  ;;  %v1898_v62 = vsel %vm1886_vm3, %v1838_v17, %v1892_v21 }
 0x450   : > { %v1900_v25 = vsel %vm1888_vm4, %v1880_v20, %v1894_v24  ;;  %1905 = vst [vmem:[%s2617_s30 + $0x18] sm:$0xff] %v1898_v62 }
 0x451   : > { %v1899_v26 = vsel %vm1887_vm5, %v1840_v22, %v1893_v59  ;;  %1907 = vst.msk [vmem:[%s2617_s30 + $0x28] sm:$0xff] %vm1903_vm13, %v1900_v25 }
 0x452   : > { %1906 = vst [vmem:[%s2617_s30 + $0x20] sm:$0xff] %v1899_v26 }
 0x453 PF: > { %s16_s21 = sadd.s32 1, %s2147_s21  }
 0x454   : > { %p13_p4 = scmp.ge.s32.totalorder %s16_s21, 4  }
 0x456   :  { %15 = sbr.rel (!%p13_p4) target bundleno = 1 (0x1), region = 77 }

</bundles_post_ra>
